<compile_context>
chip_gen: v6e
topology: v6e:2x2x1
jax: 0.10.0
libtpu: 0.0.40
codegen_flags: <defaults>
</compile_context>

<pallas_src>
import functools
import math

import jax
import jax.numpy as jnp
from jax import lax
from jax.experimental import pallas as pl
from jax.experimental.pallas import tpu as pltpu

# dot_general dimension numbers for A @ B.T without materializing B.T
_TRANS_B = (((1,), (1,)), ((), ()))


def _mhsa_kernel(xq_ref, xkv_ref, wqkv_ref, wu_ref, bu_ref, o_ref,
                 q_sc, m_sc, l_sc, acc_sc, *, num_heads: int, head_dim: int):
    """One grid step: one (batch, q-tile, kv-tile) triple.

    xq_ref   : (TQ,  K)        query-side input rows (batch dim squeezed)
    xkv_ref  : (TKV, K)        key/value-side input rows
    wqkv_ref : (K, 3*H*K)      [Wq*scale | Wk | Wv], pre-transposed
    wu_ref   : (H, K, K)       unify_heads weight, head-major: wu[h, i, o]
    bu_ref   : (1, K)          unify_heads bias
    o_ref    : (TQ, K)         output rows
    q_sc     : (H, TQ, K)      per-head scaled queries (cached per q tile)
    m_sc     : (H, TQ, 1)      online-softmax running max
    l_sc     : (H, TQ, 1)      online-softmax running denominator
    acc_sc   : (H, TQ, K)      online-softmax running numerator
    """
    H, Kh = num_heads, head_dim
    HK = H * Kh
    ki = pl.program_id(2)

    @pl.when(ki == 0)
    def _init():
        # Q projection once per (batch, q-tile); 1/sqrt(k) folded into Wq.
        q = jnp.dot(xq_ref[...], wqkv_ref[:, :HK],
                    preferred_element_type=jnp.float32)            # (TQ, H*Kh)
        for h in range(H):
            q_sc[h] = q[:, h * Kh:(h + 1) * Kh]
        m_sc[...] = jnp.full(m_sc.shape, -jnp.inf, jnp.float32)
        l_sc[...] = jnp.zeros(l_sc.shape, jnp.float32)
        acc_sc[...] = jnp.zeros(acc_sc.shape, jnp.float32)

    # Fused K/V projection for this kv tile: one lane-dense MXU op (N = 2*H*Kh).
    kv = jnp.dot(xkv_ref[...], wqkv_ref[:, HK:],
                 preferred_element_type=jnp.float32)                # (TKV, 2*H*Kh)

    # Online-softmax update per head (static unroll; 2-D MXU ops only — Mosaic
    # would unroll a batched dot over heads anyway, and this avoids relayouts).
    for h in range(H):
        kh = kv[:, h * Kh:(h + 1) * Kh]                             # (TKV, Kh)
        vh = kv[:, HK + h * Kh:HK + (h + 1) * Kh]                   # (TKV, Kh)
        qh = q_sc[h]                                                # (TQ, Kh)

        s = lax.dot_general(qh, kh, _TRANS_B,
                            preferred_element_type=jnp.float32)     # (TQ, TKV)

        m_prev = m_sc[h]
        m_new = jnp.maximum(m_prev, jnp.max(s, axis=-1, keepdims=True))
        alpha = jnp.exp(m_prev - m_new)
        p = jnp.exp(s - m_new)
        l_sc[h] = alpha * l_sc[h] + jnp.sum(p, axis=-1, keepdims=True)
        acc_sc[h] = alpha * acc_sc[h] + jnp.dot(
            p, vh, preferred_element_type=jnp.float32)
        m_sc[h] = m_new

    @pl.when(ki == pl.num_programs(2) - 1)
    def _finalize():
        # Normalize and unify heads without concatenation: accumulate each
        # head_out_h @ Wu_h into one (TQ, K) tile; add bias once.
        y = jnp.zeros(o_ref.shape, jnp.float32)
        for h in range(H):
            oh = acc_sc[h] * pl.reciprocal(l_sc[h], approx=True)    # (TQ, Kh)
            y = y + jnp.dot(oh, wu_ref[h], preferred_element_type=jnp.float32)
        o_ref[...] = (y + bu_ref[...]).astype(o_ref.dtype)


def self_attention(x, w_keys, w_queries, w_values, w_unify, b_unify,
                   *, num_heads: int, block_q=None, block_kv=None):
    """x: (B, T, K) -> (B, T, K); weights follow nn.Linear (out, in) layout."""
    B, T, K = x.shape
    H = num_heads
    HK = H * K
    assert w_keys.shape == (HK, K) and w_queries.shape == (HK, K)
    assert w_values.shape == (HK, K)
    assert w_unify.shape == (K, HK) and b_unify.shape == (K,)

    # --- weight preprocessing (free, outside the kernel) -------------------
    scale = 1.0 / math.sqrt(K)
    # Fused, pre-transposed QKV weight: (K, 3*H*K) = [Wq*scale | Wk | Wv].
    w_qkv_t = jnp.concatenate(
        [(w_queries * scale).T, w_keys.T, w_values.T], axis=1)
    # unify_heads weight, head-major: wu_h[h, i, o] = w_unify[o, h*K + i].
    w_unify_h = jnp.transpose(w_unify.reshape(K, H, K), (1, 2, 0))
    b_unify_2d = b_unify.reshape(1, K)

    # --- sequence tiling ----------------------------------------------------
    def _pick(t, requested):
        if requested is not None:
            assert t % requested == 0, "tile must divide sequence length"
            return requested
        for cand in (256, 128):
            if t % cand == 0:
                return cand
        return t  # short sequences: single tile
    tq = _pick(T, block_q)
    tkv = _pick(T, block_kv)
    assert (tq % 8 == 0 or tq == T) and (tkv % 8 == 0 or tkv == T)

    grid = (B, T // tq, T // tkv)
    kernel = functools.partial(_mhsa_kernel, num_heads=H, head_dim=K)

    return pl.pallas_call(
        kernel,
        out_shape=jax.ShapeDtypeStruct((B, T, K), x.dtype),
        grid_spec=pltpu.PrefetchScalarGridSpec(
            num_scalar_prefetch=0,
            grid=grid,
            in_specs=[
                pl.BlockSpec((None, tq, K), lambda b, qi, ki: (b, qi, 0)),   # x (query rows)
                pl.BlockSpec((None, tkv, K), lambda b, qi, ki: (b, ki, 0)),  # x (key/value rows)
                pl.BlockSpec((K, 3 * HK), lambda b, qi, ki: (0, 0)),         # fused QKV weight^T
                pl.BlockSpec((H, K, K), lambda b, qi, ki: (0, 0, 0)),        # unify weight (head-major)
                pl.BlockSpec((1, K), lambda b, qi, ki: (0, 0)),              # unify bias
            ],
            out_specs=pl.BlockSpec((None, tq, K), lambda b, qi, ki: (b, qi, 0)),
            scratch_shapes=[
                pltpu.VMEM((H, tq, K), jnp.float32),   # cached scaled Q
                pltpu.VMEM((H, tq, 1), jnp.float32),   # running max
                pltpu.VMEM((H, tq, 1), jnp.float32),   # running denom
                pltpu.VMEM((H, tq, K), jnp.float32),   # running numerator
            ],
        ),
        compiler_params=pltpu.CompilerParams(
            dimension_semantics=("parallel", "parallel", "arbitrary"),
            vmem_limit_bytes=32 * 1024 * 1024,
        ),
    )(x, x, w_qkv_t, w_unify_h, b_unify_2d)


def _reference(x, w_keys, w_queries, w_values, w_unify, b_unify, num_heads):
    """Pure-JAX reference mirroring the PyTorch forward exactly."""
    b, t, k = x.shape
    h = num_heads
    keys = (x @ w_keys.T).reshape(b, t, h, k)
    queries = (x @ w_queries.T).reshape(b, t, h, k)
    values = (x @ w_values.T).reshape(b, t, h, k)
    keys = jnp.transpose(keys, (0, 2, 1, 3)).reshape(b * h, t, k)
    queries = jnp.transpose(queries, (0, 2, 1, 3)).reshape(b * h, t, k)
    values = jnp.transpose(values, (0, 2, 1, 3)).reshape(b * h, t, k)
    dot = jnp.einsum('ntk,nsk->nts', queries, keys) / math.sqrt(k)
    dot = jax.nn.softmax(dot, axis=2)
    out = jnp.einsum('nts,nsk->ntk', dot, values).reshape(b, h, t, k)
    out = jnp.transpose(out, (0, 2, 1, 3)).reshape(b, t, h * k)
    return out @ w_unify.T + b_unify


if __name__ == "__main__":
    B, T, K, H = 2, 16, 32, 4   # batch, seq, embedding_dimension, num_heads

    key = jax.random.PRNGKey(0)
    kx, kk, kq, kv, ku, kb = jax.random.split(key, 6)

    x = jax.random.normal(kx, (B, T, K), dtype=jnp.float32)
    # nn.Linear-style weights (out_features, in_features), deterministic init.
    w_keys = jax.random.normal(kk, (H * K, K), dtype=jnp.float32) * 0.05
    w_queries = jax.random.normal(kq, (H * K, K), dtype=jnp.float32) * 0.05
    w_values = jax.random.normal(kv, (H * K, K), dtype=jnp.float32) * 0.05
    w_unify = jax.random.normal(ku, (K, H * K), dtype=jnp.float32) * 0.05
    b_unify = jax.random.normal(kb, (K,), dtype=jnp.float32) * 0.05

    # Small tiles so the demo actually exercises the multi-tile online-softmax
    # path (grid = (2, 2, 2)); production would use 128-256 row tiles.
    out = self_attention(x, w_keys, w_queries, w_values, w_unify, b_unify,
                         num_heads=H, block_q=8, block_kv=8)
    out = jax.block_until_ready(out)

    ref = _reference(x, w_keys, w_queries, w_values, w_unify, b_unify, H)
    assert out.shape == (B, T, K)
    # tolerance covers the approximate (EUP) reciprocal in the softmax normalize
    assert jnp.allclose(out, ref, atol=2e-3, rtol=2e-3), "mismatch vs reference"

    print("KERNEL_OK")
</pallas_src>

<mosaic_0001>
module attributes {stable_mosaic.version = 11 : i64} {
  func.func @_mhsa_kernel(%arg0: i32, %arg1: i32, %arg2: i32, %arg3: memref<1x8x32xf32, #tpu.memory_space<vmem>>, %arg4: memref<1x8x32xf32, #tpu.memory_space<vmem>>, %arg5: memref<32x384xf32, #tpu.memory_space<vmem>>, %arg6: memref<4x32x32xf32, #tpu.memory_space<vmem>>, %arg7: memref<1x32xf32, #tpu.memory_space<vmem>>, %arg8: memref<1x8x32xf32, #tpu.memory_space<vmem>>, %arg9: memref<4x8x32xf32, #tpu.memory_space<vmem>>, %arg10: memref<4x8x1xf32, #tpu.memory_space<vmem>>, %arg11: memref<4x8x1xf32, #tpu.memory_space<vmem>>, %arg12: memref<4x8x32xf32, #tpu.memory_space<vmem>>) attributes {dimension_semantics = [#tpu.dimension_semantics<parallel>, #tpu.dimension_semantics<parallel>, #tpu.dimension_semantics<arbitrary>], iteration_bounds = array<i64: 2, 2, 2>, scalar_prefetch = 0 : i64, scratch_operands = 4 : i64, tpu.core_type = #tpu.core_type<tc>, window_params = [{transform_indices = @transform_0, window_bounds = array<i64: 1, 8, 32>}, {transform_indices = @transform_1, window_bounds = array<i64: 1, 8, 32>}, {pipeline_mode = #tpu.pipeline_mode<synchronous>, transform_indices = @transform_2, window_bounds = array<i64: 32, 384>}, {pipeline_mode = #tpu.pipeline_mode<synchronous>, transform_indices = @transform_3, window_bounds = array<i64: 4, 32, 32>}, {pipeline_mode = #tpu.pipeline_mode<synchronous>, transform_indices = @transform_4, window_bounds = array<i64: 1, 32>}, {transform_indices = @transform_5, window_bounds = array<i64: 1, 8, 32>}]} {
    %c0_i32 = arith.constant 0 : i32
    %0 = arith.cmpi eq, %arg2, %c0_i32 : i32
    %1 = arith.extui %0 : i1 to i32
    %c0_i32_0 = arith.constant 0 : i32
    %2 = arith.cmpi ne, %1, %c0_i32_0 : i32
    scf.if %2 {
      %c0_102 = arith.constant 0 : index
      %c0_103 = arith.constant 0 : index
      %c0_104 = arith.constant 0 : index
      %154 = vector.load %arg3[%c0_102, %c0_103, %c0_104] : memref<1x8x32xf32, #tpu.memory_space<vmem>>, vector<1x8x32xf32>
      %155 = vector.shape_cast %154 : vector<1x8x32xf32> to vector<8x32xf32>
      %c0_105 = arith.constant 0 : index
      %c0_106 = arith.constant 0 : index
      %156 = vector.load %arg5[%c0_105, %c0_106] : memref<32x384xf32, #tpu.memory_space<vmem>>, vector<32x128xf32>
      %cst_107 = arith.constant dense<0.000000e+00> : vector<8x128xf32>
      %157 = tpu.matmul %155, %156, %cst_107 {dimension_numbers = #tpu.dot_dimension_numbers<[1], [0], [0], [1], [0, 0, 1, 1], [], []>} : vector<8x32xf32>, vector<32x128xf32>, vector<8x128xf32> -> vector<8x128xf32>
      %158 = vector.extract_strided_slice %157 {offsets = [0, 0], sizes = [8, 32], strides = [1, 1]} : vector<8x128xf32> to vector<8x32xf32>
      %c0_108 = arith.constant 0 : index
      %c0_109 = arith.constant 0 : index
      %c0_110 = arith.constant 0 : index
      %159 = vector.load %arg9[%c0_108, %c0_109, %c0_110] : memref<4x8x32xf32, #tpu.memory_space<vmem>>, vector<1x8x32xf32>
      %160 = vector.shape_cast %159 : vector<1x8x32xf32> to vector<8x32xf32>
      %161 = vector.shape_cast %158 : vector<8x32xf32> to vector<1x8x32xf32>
      tpu.vector_store %arg9[%c0_108, %c0_109, %c0_110], %161 {strides = array<i32>} : memref<4x8x32xf32, #tpu.memory_space<vmem>>, vector<1x8x32xf32>,
      %162 = vector.extract_strided_slice %157 {offsets = [0, 32], sizes = [8, 32], strides = [1, 1]} : vector<8x128xf32> to vector<8x32xf32>
      %c1_111 = arith.constant 1 : index
      %c0_112 = arith.constant 0 : index
      %c0_113 = arith.constant 0 : index
      %163 = vector.load %arg9[%c1_111, %c0_112, %c0_113] : memref<4x8x32xf32, #tpu.memory_space<vmem>>, vector<1x8x32xf32>
      %164 = vector.shape_cast %163 : vector<1x8x32xf32> to vector<8x32xf32>
      %165 = vector.shape_cast %162 : vector<8x32xf32> to vector<1x8x32xf32>
      tpu.vector_store %arg9[%c1_111, %c0_112, %c0_113], %165 {strides = array<i32>} : memref<4x8x32xf32, #tpu.memory_space<vmem>>, vector<1x8x32xf32>,
      %166 = vector.extract_strided_slice %157 {offsets = [0, 64], sizes = [8, 32], strides = [1, 1]} : vector<8x128xf32> to vector<8x32xf32>
      %c2_114 = arith.constant 2 : index
      %c0_115 = arith.constant 0 : index
      %c0_116 = arith.constant 0 : index
      %167 = vector.load %arg9[%c2_114, %c0_115, %c0_116] : memref<4x8x32xf32, #tpu.memory_space<vmem>>, vector<1x8x32xf32>
      %168 = vector.shape_cast %167 : vector<1x8x32xf32> to vector<8x32xf32>
      %169 = vector.shape_cast %166 : vector<8x32xf32> to vector<1x8x32xf32>
      tpu.vector_store %arg9[%c2_114, %c0_115, %c0_116], %169 {strides = array<i32>} : memref<4x8x32xf32, #tpu.memory_space<vmem>>, vector<1x8x32xf32>,
      %170 = vector.extract_strided_slice %157 {offsets = [0, 96], sizes = [8, 32], strides = [1, 1]} : vector<8x128xf32> to vector<8x32xf32>
      %c3_117 = arith.constant 3 : index
      %c0_118 = arith.constant 0 : index
      %c0_119 = arith.constant 0 : index
      %171 = vector.load %arg9[%c3_117, %c0_118, %c0_119] : memref<4x8x32xf32, #tpu.memory_space<vmem>>, vector<1x8x32xf32>
      %172 = vector.shape_cast %171 : vector<1x8x32xf32> to vector<8x32xf32>
      %173 = vector.shape_cast %170 : vector<8x32xf32> to vector<1x8x32xf32>
      tpu.vector_store %arg9[%c3_117, %c0_118, %c0_119], %173 {strides = array<i32>} : memref<4x8x32xf32, #tpu.memory_space<vmem>>, vector<1x8x32xf32>,
      %cst_120 = arith.constant 0xFF800000 : f32
      %174 = vector.broadcast %cst_120 : f32 to vector<4x8x1xf32>
      %c0_121 = arith.constant 0 : index
      %c0_122 = arith.constant 0 : index
      %c0_123 = arith.constant 0 : index
      %175 = vector.load %arg10[%c0_121, %c0_122, %c0_123] : memref<4x8x1xf32, #tpu.memory_space<vmem>>, vector<4x8x1xf32>
      tpu.vector_store %arg10[%c0_121, %c0_122, %c0_123], %174 {strides = array<i32>} : memref<4x8x1xf32, #tpu.memory_space<vmem>>, vector<4x8x1xf32>,
      %cst_124 = arith.constant 0.000000e+00 : f32
      %176 = vector.broadcast %cst_124 : f32 to vector<4x8x1xf32>
      %c0_125 = arith.constant 0 : index
      %c0_126 = arith.constant 0 : index
      %c0_127 = arith.constant 0 : index
      %177 = vector.load %arg11[%c0_125, %c0_126, %c0_127] : memref<4x8x1xf32, #tpu.memory_space<vmem>>, vector<4x8x1xf32>
      tpu.vector_store %arg11[%c0_125, %c0_126, %c0_127], %176 {strides = array<i32>} : memref<4x8x1xf32, #tpu.memory_space<vmem>>, vector<4x8x1xf32>,
      %cst_128 = arith.constant 0.000000e+00 : f32
      %178 = vector.broadcast %cst_128 : f32 to vector<4x8x32xf32>
      %c0_129 = arith.constant 0 : index
      %c0_130 = arith.constant 0 : index
      %c0_131 = arith.constant 0 : index
      %179 = vector.load %arg12[%c0_129, %c0_130, %c0_131] : memref<4x8x32xf32, #tpu.memory_space<vmem>>, vector<4x8x32xf32>
      tpu.vector_store %arg12[%c0_129, %c0_130, %c0_131], %178 {strides = array<i32>} : memref<4x8x32xf32, #tpu.memory_space<vmem>>, vector<4x8x32xf32>,
    } else {
    }
    %c0 = arith.constant 0 : index
    %c0_1 = arith.constant 0 : index
    %c0_2 = arith.constant 0 : index
    %3 = vector.load %arg4[%c0, %c0_1, %c0_2] : memref<1x8x32xf32, #tpu.memory_space<vmem>>, vector<1x8x32xf32>
    %4 = vector.shape_cast %3 : vector<1x8x32xf32> to vector<8x32xf32>
    %c0_3 = arith.constant 0 : index
    %c128 = arith.constant 128 : index
    %5 = vector.load %arg5[%c0_3, %c128] : memref<32x384xf32, #tpu.memory_space<vmem>>, vector<32x256xf32>
    %cst = arith.constant dense<0.000000e+00> : vector<8x256xf32>
    %6 = tpu.matmul %4, %5, %cst {dimension_numbers = #tpu.dot_dimension_numbers<[1], [0], [0], [1], [0, 0, 1, 1], [], []>} : vector<8x32xf32>, vector<32x256xf32>, vector<8x256xf32> -> vector<8x256xf32>
    %7 = vector.extract_strided_slice %6 {offsets = [0, 0], sizes = [8, 32], strides = [1, 1]} : vector<8x256xf32> to vector<8x32xf32>
    %8 = vector.extract_strided_slice %6 {offsets = [0, 128], sizes = [8, 32], strides = [1, 1]} : vector<8x256xf32> to vector<8x32xf32>
    %c0_4 = arith.constant 0 : index
    %c0_5 = arith.constant 0 : index
    %c0_6 = arith.constant 0 : index
    %9 = vector.load %arg9[%c0_4, %c0_5, %c0_6] : memref<4x8x32xf32, #tpu.memory_space<vmem>>, vector<1x8x32xf32>
    %10 = vector.shape_cast %9 : vector<1x8x32xf32> to vector<8x32xf32>
    %cst_7 = arith.constant dense<0.000000e+00> : vector<8x8xf32>
    %11 = tpu.matmul %10, %7, %cst_7 {dimension_numbers = #tpu.dot_dimension_numbers<[1], [1], [0], [0], [0, 0, 1, 0], [], []>} : vector<8x32xf32>, vector<8x32xf32>, vector<8x8xf32> -> vector<8x8xf32>
    %c0_8 = arith.constant 0 : index
    %c0_9 = arith.constant 0 : index
    %c0_10 = arith.constant 0 : index
    %12 = vector.load %arg10[%c0_8, %c0_9, %c0_10] : memref<4x8x1xf32, #tpu.memory_space<vmem>>, vector<1x8x1xf32>
    %13 = vector.shape_cast %12 : vector<1x8x1xf32> to vector<8x1xf32>
    %cst_11 = arith.constant dense<0xFF800000> : vector<8xf32>
    %14 = vector.multi_reduction <maximumf>, %11, %cst_11 [1] : vector<8x8xf32> to vector<8xf32>
    %15 = vector.shape_cast %14 : vector<8xf32> to vector<8x1xf32>
    %16 = arith.maximumf %13, %15 : vector<8x1xf32>
    %17 = arith.subf %13, %16 : vector<8x1xf32>
    %18 = math.exp %17 : vector<8x1xf32>
    %19 = vector.broadcast %16 : vector<8x1xf32> to vector<8x8xf32>
    %20 = arith.subf %11, %19 : vector<8x8xf32>
    %21 = math.exp %20 : vector<8x8xf32>
    %c0_12 = arith.constant 0 : index
    %c0_13 = arith.constant 0 : index
    %c0_14 = arith.constant 0 : index
    %22 = vector.load %arg11[%c0_12, %c0_13, %c0_14] : memref<4x8x1xf32, #tpu.memory_space<vmem>>, vector<1x8x1xf32>
    %23 = vector.shape_cast %22 : vector<1x8x1xf32> to vector<8x1xf32>
    %24 = arith.mulf %18, %23 : vector<8x1xf32>
    %cst_15 = arith.constant dense<0.000000e+00> : vector<8xf32>
    %25 = vector.multi_reduction <add>, %21, %cst_15 [1] : vector<8x8xf32> to vector<8xf32>
    %26 = vector.shape_cast %25 : vector<8xf32> to vector<8x1xf32>
    %27 = arith.addf %24, %26 : vector<8x1xf32>
    %c0_16 = arith.constant 0 : index
    %c0_17 = arith.constant 0 : index
    %c0_18 = arith.constant 0 : index
    %28 = vector.load %arg11[%c0_16, %c0_17, %c0_18] : memref<4x8x1xf32, #tpu.memory_space<vmem>>, vector<1x8x1xf32>
    %29 = vector.shape_cast %28 : vector<1x8x1xf32> to vector<8x1xf32>
    %30 = vector.shape_cast %27 : vector<8x1xf32> to vector<1x8x1xf32>
    tpu.vector_store %arg11[%c0_16, %c0_17, %c0_18], %30 {strides = array<i32>} : memref<4x8x1xf32, #tpu.memory_space<vmem>>, vector<1x8x1xf32>,
    %c0_19 = arith.constant 0 : index
    %c0_20 = arith.constant 0 : index
    %c0_21 = arith.constant 0 : index
    %31 = vector.load %arg12[%c0_19, %c0_20, %c0_21] : memref<4x8x32xf32, #tpu.memory_space<vmem>>, vector<1x8x32xf32>
    %32 = vector.shape_cast %31 : vector<1x8x32xf32> to vector<8x32xf32>
    %33 = vector.broadcast %18 : vector<8x1xf32> to vector<8x32xf32>
    %34 = arith.mulf %33, %32 : vector<8x32xf32>
    %cst_22 = arith.constant dense<0.000000e+00> : vector<8x32xf32>
    %35 = tpu.matmul %21, %8, %cst_22 {dimension_numbers = #tpu.dot_dimension_numbers<[1], [0], [0], [1], [0, 0, 1, 1], [], []>} : vector<8x8xf32>, vector<8x32xf32>, vector<8x32xf32> -> vector<8x32xf32>
    %36 = arith.addf %34, %35 : vector<8x32xf32>
    %c0_23 = arith.constant 0 : index
    %c0_24 = arith.constant 0 : index
    %c0_25 = arith.constant 0 : index
    %37 = vector.load %arg12[%c0_23, %c0_24, %c0_25] : memref<4x8x32xf32, #tpu.memory_space<vmem>>, vector<1x8x32xf32>
    %38 = vector.shape_cast %37 : vector<1x8x32xf32> to vector<8x32xf32>
    %39 = vector.shape_cast %36 : vector<8x32xf32> to vector<1x8x32xf32>
    tpu.vector_store %arg12[%c0_23, %c0_24, %c0_25], %39 {strides = array<i32>} : memref<4x8x32xf32, #tpu.memory_space<vmem>>, vector<1x8x32xf32>,
    %c0_26 = arith.constant 0 : index
    %c0_27 = arith.constant 0 : index
    %c0_28 = arith.constant 0 : index
    %40 = vector.load %arg10[%c0_26, %c0_27, %c0_28] : memref<4x8x1xf32, #tpu.memory_space<vmem>>, vector<1x8x1xf32>
    %41 = vector.shape_cast %40 : vector<1x8x1xf32> to vector<8x1xf32>
    %42 = vector.shape_cast %16 : vector<8x1xf32> to vector<1x8x1xf32>
    tpu.vector_store %arg10[%c0_26, %c0_27, %c0_28], %42 {strides = array<i32>} : memref<4x8x1xf32, #tpu.memory_space<vmem>>, vector<1x8x1xf32>,
    %43 = vector.extract_strided_slice %6 {offsets = [0, 32], sizes = [8, 32], strides = [1, 1]} : vector<8x256xf32> to vector<8x32xf32>
    %44 = vector.extract_strided_slice %6 {offsets = [0, 160], sizes = [8, 32], strides = [1, 1]} : vector<8x256xf32> to vector<8x32xf32>
    %c1 = arith.constant 1 : index
    %c0_29 = arith.constant 0 : index
    %c0_30 = arith.constant 0 : index
    %45 = vector.load %arg9[%c1, %c0_29, %c0_30] : memref<4x8x32xf32, #tpu.memory_space<vmem>>, vector<1x8x32xf32>
    %46 = vector.shape_cast %45 : vector<1x8x32xf32> to vector<8x32xf32>
    %cst_31 = arith.constant dense<0.000000e+00> : vector<8x8xf32>
    %47 = tpu.matmul %46, %43, %cst_31 {dimension_numbers = #tpu.dot_dimension_numbers<[1], [1], [0], [0], [0, 0, 1, 0], [], []>} : vector<8x32xf32>, vector<8x32xf32>, vector<8x8xf32> -> vector<8x8xf32>
    %c1_32 = arith.constant 1 : index
    %c0_33 = arith.constant 0 : index
    %c0_34 = arith.constant 0 : index
    %48 = vector.load %arg10[%c1_32, %c0_33, %c0_34] : memref<4x8x1xf32, #tpu.memory_space<vmem>>, vector<1x8x1xf32>
    %49 = vector.shape_cast %48 : vector<1x8x1xf32> to vector<8x1xf32>
    %cst_35 = arith.constant dense<0xFF800000> : vector<8xf32>
    %50 = vector.multi_reduction <maximumf>, %47, %cst_35 [1] : vector<8x8xf32> to vector<8xf32>
    %51 = vector.shape_cast %50 : vector<8xf32> to vector<8x1xf32>
    %52 = arith.maximumf %49, %51 : vector<8x1xf32>
    %53 = arith.subf %49, %52 : vector<8x1xf32>
    %54 = math.exp %53 : vector<8x1xf32>
    %55 = vector.broadcast %52 : vector<8x1xf32> to vector<8x8xf32>
    %56 = arith.subf %47, %55 : vector<8x8xf32>
    %57 = math.exp %56 : vector<8x8xf32>
    %c1_36 = arith.constant 1 : index
    %c0_37 = arith.constant 0 : index
    %c0_38 = arith.constant 0 : index
    %58 = vector.load %arg11[%c1_36, %c0_37, %c0_38] : memref<4x8x1xf32, #tpu.memory_space<vmem>>, vector<1x8x1xf32>
    %59 = vector.shape_cast %58 : vector<1x8x1xf32> to vector<8x1xf32>
    %60 = arith.mulf %54, %59 : vector<8x1xf32>
    %cst_39 = arith.constant dense<0.000000e+00> : vector<8xf32>
    %61 = vector.multi_reduction <add>, %57, %cst_39 [1] : vector<8x8xf32> to vector<8xf32>
    %62 = vector.shape_cast %61 : vector<8xf32> to vector<8x1xf32>
    %63 = arith.addf %60, %62 : vector<8x1xf32>
    %c1_40 = arith.constant 1 : index
    %c0_41 = arith.constant 0 : index
    %c0_42 = arith.constant 0 : index
    %64 = vector.load %arg11[%c1_40, %c0_41, %c0_42] : memref<4x8x1xf32, #tpu.memory_space<vmem>>, vector<1x8x1xf32>
    %65 = vector.shape_cast %64 : vector<1x8x1xf32> to vector<8x1xf32>
    %66 = vector.shape_cast %63 : vector<8x1xf32> to vector<1x8x1xf32>
    tpu.vector_store %arg11[%c1_40, %c0_41, %c0_42], %66 {strides = array<i32>} : memref<4x8x1xf32, #tpu.memory_space<vmem>>, vector<1x8x1xf32>,
    %c1_43 = arith.constant 1 : index
    %c0_44 = arith.constant 0 : index
    %c0_45 = arith.constant 0 : index
    %67 = vector.load %arg12[%c1_43, %c0_44, %c0_45] : memref<4x8x32xf32, #tpu.memory_space<vmem>>, vector<1x8x32xf32>
    %68 = vector.shape_cast %67 : vector<1x8x32xf32> to vector<8x32xf32>
    %69 = vector.broadcast %54 : vector<8x1xf32> to vector<8x32xf32>
    %70 = arith.mulf %69, %68 : vector<8x32xf32>
    %cst_46 = arith.constant dense<0.000000e+00> : vector<8x32xf32>
    %71 = tpu.matmul %57, %44, %cst_46 {dimension_numbers = #tpu.dot_dimension_numbers<[1], [0], [0], [1], [0, 0, 1, 1], [], []>} : vector<8x8xf32>, vector<8x32xf32>, vector<8x32xf32> -> vector<8x32xf32>
    %72 = arith.addf %70, %71 : vector<8x32xf32>
    %c1_47 = arith.constant 1 : index
    %c0_48 = arith.constant 0 : index
    %c0_49 = arith.constant 0 : index
    %73 = vector.load %arg12[%c1_47, %c0_48, %c0_49] : memref<4x8x32xf32, #tpu.memory_space<vmem>>, vector<1x8x32xf32>
    %74 = vector.shape_cast %73 : vector<1x8x32xf32> to vector<8x32xf32>
    %75 = vector.shape_cast %72 : vector<8x32xf32> to vector<1x8x32xf32>
    tpu.vector_store %arg12[%c1_47, %c0_48, %c0_49], %75 {strides = array<i32>} : memref<4x8x32xf32, #tpu.memory_space<vmem>>, vector<1x8x32xf32>,
    %c1_50 = arith.constant 1 : index
    %c0_51 = arith.constant 0 : index
    %c0_52 = arith.constant 0 : index
    %76 = vector.load %arg10[%c1_50, %c0_51, %c0_52] : memref<4x8x1xf32, #tpu.memory_space<vmem>>, vector<1x8x1xf32>
    %77 = vector.shape_cast %76 : vector<1x8x1xf32> to vector<8x1xf32>
    %78 = vector.shape_cast %52 : vector<8x1xf32> to vector<1x8x1xf32>
    tpu.vector_store %arg10[%c1_50, %c0_51, %c0_52], %78 {strides = array<i32>} : memref<4x8x1xf32, #tpu.memory_space<vmem>>, vector<1x8x1xf32>,
    %79 = vector.extract_strided_slice %6 {offsets = [0, 64], sizes = [8, 32], strides = [1, 1]} : vector<8x256xf32> to vector<8x32xf32>
    %80 = vector.extract_strided_slice %6 {offsets = [0, 192], sizes = [8, 32], strides = [1, 1]} : vector<8x256xf32> to vector<8x32xf32>
    %c2 = arith.constant 2 : index
    %c0_53 = arith.constant 0 : index
    %c0_54 = arith.constant 0 : index
    %81 = vector.load %arg9[%c2, %c0_53, %c0_54] : memref<4x8x32xf32, #tpu.memory_space<vmem>>, vector<1x8x32xf32>
    %82 = vector.shape_cast %81 : vector<1x8x32xf32> to vector<8x32xf32>
    %cst_55 = arith.constant dense<0.000000e+00> : vector<8x8xf32>
    %83 = tpu.matmul %82, %79, %cst_55 {dimension_numbers = #tpu.dot_dimension_numbers<[1], [1], [0], [0], [0, 0, 1, 0], [], []>} : vector<8x32xf32>, vector<8x32xf32>, vector<8x8xf32> -> vector<8x8xf32>
    %c2_56 = arith.constant 2 : index
    %c0_57 = arith.constant 0 : index
    %c0_58 = arith.constant 0 : index
    %84 = vector.load %arg10[%c2_56, %c0_57, %c0_58] : memref<4x8x1xf32, #tpu.memory_space<vmem>>, vector<1x8x1xf32>
    %85 = vector.shape_cast %84 : vector<1x8x1xf32> to vector<8x1xf32>
    %cst_59 = arith.constant dense<0xFF800000> : vector<8xf32>
    %86 = vector.multi_reduction <maximumf>, %83, %cst_59 [1] : vector<8x8xf32> to vector<8xf32>
    %87 = vector.shape_cast %86 : vector<8xf32> to vector<8x1xf32>
    %88 = arith.maximumf %85, %87 : vector<8x1xf32>
    %89 = arith.subf %85, %88 : vector<8x1xf32>
    %90 = math.exp %89 : vector<8x1xf32>
    %91 = vector.broadcast %88 : vector<8x1xf32> to vector<8x8xf32>
    %92 = arith.subf %83, %91 : vector<8x8xf32>
    %93 = math.exp %92 : vector<8x8xf32>
    %c2_60 = arith.constant 2 : index
    %c0_61 = arith.constant 0 : index
    %c0_62 = arith.constant 0 : index
    %94 = vector.load %arg11[%c2_60, %c0_61, %c0_62] : memref<4x8x1xf32, #tpu.memory_space<vmem>>, vector<1x8x1xf32>
    %95 = vector.shape_cast %94 : vector<1x8x1xf32> to vector<8x1xf32>
    %96 = arith.mulf %90, %95 : vector<8x1xf32>
    %cst_63 = arith.constant dense<0.000000e+00> : vector<8xf32>
    %97 = vector.multi_reduction <add>, %93, %cst_63 [1] : vector<8x8xf32> to vector<8xf32>
    %98 = vector.shape_cast %97 : vector<8xf32> to vector<8x1xf32>
    %99 = arith.addf %96, %98 : vector<8x1xf32>
    %c2_64 = arith.constant 2 : index
    %c0_65 = arith.constant 0 : index
    %c0_66 = arith.constant 0 : index
    %100 = vector.load %arg11[%c2_64, %c0_65, %c0_66] : memref<4x8x1xf32, #tpu.memory_space<vmem>>, vector<1x8x1xf32>
    %101 = vector.shape_cast %100 : vector<1x8x1xf32> to vector<8x1xf32>
    %102 = vector.shape_cast %99 : vector<8x1xf32> to vector<1x8x1xf32>
    tpu.vector_store %arg11[%c2_64, %c0_65, %c0_66], %102 {strides = array<i32>} : memref<4x8x1xf32, #tpu.memory_space<vmem>>, vector<1x8x1xf32>,
    %c2_67 = arith.constant 2 : index
    %c0_68 = arith.constant 0 : index
    %c0_69 = arith.constant 0 : index
    %103 = vector.load %arg12[%c2_67, %c0_68, %c0_69] : memref<4x8x32xf32, #tpu.memory_space<vmem>>, vector<1x8x32xf32>
    %104 = vector.shape_cast %103 : vector<1x8x32xf32> to vector<8x32xf32>
    %105 = vector.broadcast %90 : vector<8x1xf32> to vector<8x32xf32>
    %106 = arith.mulf %105, %104 : vector<8x32xf32>
    %cst_70 = arith.constant dense<0.000000e+00> : vector<8x32xf32>
    %107 = tpu.matmul %93, %80, %cst_70 {dimension_numbers = #tpu.dot_dimension_numbers<[1], [0], [0], [1], [0, 0, 1, 1], [], []>} : vector<8x8xf32>, vector<8x32xf32>, vector<8x32xf32> -> vector<8x32xf32>
    %108 = arith.addf %106, %107 : vector<8x32xf32>
    %c2_71 = arith.constant 2 : index
    %c0_72 = arith.constant 0 : index
    %c0_73 = arith.constant 0 : index
    %109 = vector.load %arg12[%c2_71, %c0_72, %c0_73] : memref<4x8x32xf32, #tpu.memory_space<vmem>>, vector<1x8x32xf32>
    %110 = vector.shape_cast %109 : vector<1x8x32xf32> to vector<8x32xf32>
    %111 = vector.shape_cast %108 : vector<8x32xf32> to vector<1x8x32xf32>
    tpu.vector_store %arg12[%c2_71, %c0_72, %c0_73], %111 {strides = array<i32>} : memref<4x8x32xf32, #tpu.memory_space<vmem>>, vector<1x8x32xf32>,
    %c2_74 = arith.constant 2 : index
    %c0_75 = arith.constant 0 : index
    %c0_76 = arith.constant 0 : index
    %112 = vector.load %arg10[%c2_74, %c0_75, %c0_76] : memref<4x8x1xf32, #tpu.memory_space<vmem>>, vector<1x8x1xf32>
    %113 = vector.shape_cast %112 : vector<1x8x1xf32> to vector<8x1xf32>
    %114 = vector.shape_cast %88 : vector<8x1xf32> to vector<1x8x1xf32>
    tpu.vector_store %arg10[%c2_74, %c0_75, %c0_76], %114 {strides = array<i32>} : memref<4x8x1xf32, #tpu.memory_space<vmem>>, vector<1x8x1xf32>,
    %115 = vector.extract_strided_slice %6 {offsets = [0, 96], sizes = [8, 32], strides = [1, 1]} : vector<8x256xf32> to vector<8x32xf32>
    %116 = vector.extract_strided_slice %6 {offsets = [0, 224], sizes = [8, 32], strides = [1, 1]} : vector<8x256xf32> to vector<8x32xf32>
    %c3 = arith.constant 3 : index
    %c0_77 = arith.constant 0 : index
    %c0_78 = arith.constant 0 : index
    %117 = vector.load %arg9[%c3, %c0_77, %c0_78] : memref<4x8x32xf32, #tpu.memory_space<vmem>>, vector<1x8x32xf32>
    %118 = vector.shape_cast %117 : vector<1x8x32xf32> to vector<8x32xf32>
    %cst_79 = arith.constant dense<0.000000e+00> : vector<8x8xf32>
    %119 = tpu.matmul %118, %115, %cst_79 {dimension_numbers = #tpu.dot_dimension_numbers<[1], [1], [0], [0], [0, 0, 1, 0], [], []>} : vector<8x32xf32>, vector<8x32xf32>, vector<8x8xf32> -> vector<8x8xf32>
    %c3_80 = arith.constant 3 : index
    %c0_81 = arith.constant 0 : index
    %c0_82 = arith.constant 0 : index
    %120 = vector.load %arg10[%c3_80, %c0_81, %c0_82] : memref<4x8x1xf32, #tpu.memory_space<vmem>>, vector<1x8x1xf32>
    %121 = vector.shape_cast %120 : vector<1x8x1xf32> to vector<8x1xf32>
    %cst_83 = arith.constant dense<0xFF800000> : vector<8xf32>
    %122 = vector.multi_reduction <maximumf>, %119, %cst_83 [1] : vector<8x8xf32> to vector<8xf32>
    %123 = vector.shape_cast %122 : vector<8xf32> to vector<8x1xf32>
    %124 = arith.maximumf %121, %123 : vector<8x1xf32>
    %125 = arith.subf %121, %124 : vector<8x1xf32>
    %126 = math.exp %125 : vector<8x1xf32>
    %127 = vector.broadcast %124 : vector<8x1xf32> to vector<8x8xf32>
    %128 = arith.subf %119, %127 : vector<8x8xf32>
    %129 = math.exp %128 : vector<8x8xf32>
    %c3_84 = arith.constant 3 : index
    %c0_85 = arith.constant 0 : index
    %c0_86 = arith.constant 0 : index
    %130 = vector.load %arg11[%c3_84, %c0_85, %c0_86] : memref<4x8x1xf32, #tpu.memory_space<vmem>>, vector<1x8x1xf32>
    %131 = vector.shape_cast %130 : vector<1x8x1xf32> to vector<8x1xf32>
    %132 = arith.mulf %126, %131 : vector<8x1xf32>
    %cst_87 = arith.constant dense<0.000000e+00> : vector<8xf32>
    %133 = vector.multi_reduction <add>, %129, %cst_87 [1] : vector<8x8xf32> to vector<8xf32>
    %134 = vector.shape_cast %133 : vector<8xf32> to vector<8x1xf32>
    %135 = arith.addf %132, %134 : vector<8x1xf32>
    %c3_88 = arith.constant 3 : index
    %c0_89 = arith.constant 0 : index
    %c0_90 = arith.constant 0 : index
    %136 = vector.load %arg11[%c3_88, %c0_89, %c0_90] : memref<4x8x1xf32, #tpu.memory_space<vmem>>, vector<1x8x1xf32>
    %137 = vector.shape_cast %136 : vector<1x8x1xf32> to vector<8x1xf32>
    %138 = vector.shape_cast %135 : vector<8x1xf32> to vector<1x8x1xf32>
    tpu.vector_store %arg11[%c3_88, %c0_89, %c0_90], %138 {strides = array<i32>} : memref<4x8x1xf32, #tpu.memory_space<vmem>>, vector<1x8x1xf32>,
    %c3_91 = arith.constant 3 : index
    %c0_92 = arith.constant 0 : index
    %c0_93 = arith.constant 0 : index
    %139 = vector.load %arg12[%c3_91, %c0_92, %c0_93] : memref<4x8x32xf32, #tpu.memory_space<vmem>>, vector<1x8x32xf32>
    %140 = vector.shape_cast %139 : vector<1x8x32xf32> to vector<8x32xf32>
    %141 = vector.broadcast %126 : vector<8x1xf32> to vector<8x32xf32>
    %142 = arith.mulf %141, %140 : vector<8x32xf32>
    %cst_94 = arith.constant dense<0.000000e+00> : vector<8x32xf32>
    %143 = tpu.matmul %129, %116, %cst_94 {dimension_numbers = #tpu.dot_dimension_numbers<[1], [0], [0], [1], [0, 0, 1, 1], [], []>} : vector<8x8xf32>, vector<8x32xf32>, vector<8x32xf32> -> vector<8x32xf32>
    %144 = arith.addf %142, %143 : vector<8x32xf32>
    %c3_95 = arith.constant 3 : index
    %c0_96 = arith.constant 0 : index
    %c0_97 = arith.constant 0 : index
    %145 = vector.load %arg12[%c3_95, %c0_96, %c0_97] : memref<4x8x32xf32, #tpu.memory_space<vmem>>, vector<1x8x32xf32>
    %146 = vector.shape_cast %145 : vector<1x8x32xf32> to vector<8x32xf32>
    %147 = vector.shape_cast %144 : vector<8x32xf32> to vector<1x8x32xf32>
    tpu.vector_store %arg12[%c3_95, %c0_96, %c0_97], %147 {strides = array<i32>} : memref<4x8x32xf32, #tpu.memory_space<vmem>>, vector<1x8x32xf32>,
    %c3_98 = arith.constant 3 : index
    %c0_99 = arith.constant 0 : index
    %c0_100 = arith.constant 0 : index
    %148 = vector.load %arg10[%c3_98, %c0_99, %c0_100] : memref<4x8x1xf32, #tpu.memory_space<vmem>>, vector<1x8x1xf32>
    %149 = vector.shape_cast %148 : vector<1x8x1xf32> to vector<8x1xf32>
    %150 = vector.shape_cast %124 : vector<8x1xf32> to vector<1x8x1xf32>
    tpu.vector_store %arg10[%c3_98, %c0_99, %c0_100], %150 {strides = array<i32>} : memref<4x8x1xf32, #tpu.memory_space<vmem>>, vector<1x8x1xf32>,
    %c1_i32 = arith.constant 1 : i32
    %151 = arith.cmpi eq, %arg2, %c1_i32 : i32
    %152 = arith.extui %151 : i1 to i32
    %c0_i32_101 = arith.constant 0 : i32
    %153 = arith.cmpi ne, %152, %c0_i32_101 : i32
    scf.if %153 {
      %cst_102 = arith.constant 0.000000e+00 : f32
      %154 = vector.broadcast %cst_102 : f32 to vector<8x32xf32>
      %c0_103 = arith.constant 0 : index
      %c0_104 = arith.constant 0 : index
      %c0_105 = arith.constant 0 : index
      %155 = vector.load %arg12[%c0_103, %c0_104, %c0_105] : memref<4x8x32xf32, #tpu.memory_space<vmem>>, vector<1x8x32xf32>
      %156 = vector.shape_cast %155 : vector<1x8x32xf32> to vector<8x32xf32>
      %c0_106 = arith.constant 0 : index
      %c0_107 = arith.constant 0 : index
      %c0_108 = arith.constant 0 : index
      %157 = vector.load %arg11[%c0_106, %c0_107, %c0_108] : memref<4x8x1xf32, #tpu.memory_space<vmem>>, vector<1x8x1xf32>
      %158 = vector.shape_cast %157 : vector<1x8x1xf32> to vector<8x1xf32>
      %159 = tpu.reciprocal %158 {approx = true} : vector<8x1xf32> -> vector<8x1xf32>
      %160 = vector.broadcast %159 : vector<8x1xf32> to vector<8x32xf32>
      %161 = arith.mulf %156, %160 : vector<8x32xf32>
      %c0_109 = arith.constant 0 : index
      %c0_110 = arith.constant 0 : index
      %c0_111 = arith.constant 0 : index
      %162 = vector.load %arg6[%c0_109, %c0_110, %c0_111] : memref<4x32x32xf32, #tpu.memory_space<vmem>>, vector<1x32x32xf32>
      %163 = vector.shape_cast %162 : vector<1x32x32xf32> to vector<32x32xf32>
      %cst_112 = arith.constant dense<0.000000e+00> : vector<8x32xf32>
      %164 = tpu.matmul %161, %163, %cst_112 {dimension_numbers = #tpu.dot_dimension_numbers<[1], [0], [0], [1], [0, 0, 1, 1], [], []>} : vector<8x32xf32>, vector<32x32xf32>, vector<8x32xf32> -> vector<8x32xf32>
      %165 = arith.addf %154, %164 : vector<8x32xf32>
      %c1_113 = arith.constant 1 : index
      %c0_114 = arith.constant 0 : index
      %c0_115 = arith.constant 0 : index
      %166 = vector.load %arg12[%c1_113, %c0_114, %c0_115] : memref<4x8x32xf32, #tpu.memory_space<vmem>>, vector<1x8x32xf32>
      %167 = vector.shape_cast %166 : vector<1x8x32xf32> to vector<8x32xf32>
      %c1_116 = arith.constant 1 : index
      %c0_117 = arith.constant 0 : index
      %c0_118 = arith.constant 0 : index
      %168 = vector.load %arg11[%c1_116, %c0_117, %c0_118] : memref<4x8x1xf32, #tpu.memory_space<vmem>>, vector<1x8x1xf32>
      %169 = vector.shape_cast %168 : vector<1x8x1xf32> to vector<8x1xf32>
      %170 = tpu.reciprocal %169 {approx = true} : vector<8x1xf32> -> vector<8x1xf32>
      %171 = vector.broadcast %170 : vector<8x1xf32> to vector<8x32xf32>
      %172 = arith.mulf %167, %171 : vector<8x32xf32>
      %c1_119 = arith.constant 1 : index
      %c0_120 = arith.constant 0 : index
      %c0_121 = arith.constant 0 : index
      %173 = vector.load %arg6[%c1_119, %c0_120, %c0_121] : memref<4x32x32xf32, #tpu.memory_space<vmem>>, vector<1x32x32xf32>
      %174 = vector.shape_cast %173 : vector<1x32x32xf32> to vector<32x32xf32>
      %cst_122 = arith.constant dense<0.000000e+00> : vector<8x32xf32>
      %175 = tpu.matmul %172, %174, %cst_122 {dimension_numbers = #tpu.dot_dimension_numbers<[1], [0], [0], [1], [0, 0, 1, 1], [], []>} : vector<8x32xf32>, vector<32x32xf32>, vector<8x32xf32> -> vector<8x32xf32>
      %176 = arith.addf %165, %175 : vector<8x32xf32>
      %c2_123 = arith.constant 2 : index
      %c0_124 = arith.constant 0 : index
      %c0_125 = arith.constant 0 : index
      %177 = vector.load %arg12[%c2_123, %c0_124, %c0_125] : memref<4x8x32xf32, #tpu.memory_space<vmem>>, vector<1x8x32xf32>
      %178 = vector.shape_cast %177 : vector<1x8x32xf32> to vector<8x32xf32>
      %c2_126 = arith.constant 2 : index
      %c0_127 = arith.constant 0 : index
      %c0_128 = arith.constant 0 : index
      %179 = vector.load %arg11[%c2_126, %c0_127, %c0_128] : memref<4x8x1xf32, #tpu.memory_space<vmem>>, vector<1x8x1xf32>
      %180 = vector.shape_cast %179 : vector<1x8x1xf32> to vector<8x1xf32>
      %181 = tpu.reciprocal %180 {approx = true} : vector<8x1xf32> -> vector<8x1xf32>
      %182 = vector.broadcast %181 : vector<8x1xf32> to vector<8x32xf32>
      %183 = arith.mulf %178, %182 : vector<8x32xf32>
      %c2_129 = arith.constant 2 : index
      %c0_130 = arith.constant 0 : index
      %c0_131 = arith.constant 0 : index
      %184 = vector.load %arg6[%c2_129, %c0_130, %c0_131] : memref<4x32x32xf32, #tpu.memory_space<vmem>>, vector<1x32x32xf32>
      %185 = vector.shape_cast %184 : vector<1x32x32xf32> to vector<32x32xf32>
      %cst_132 = arith.constant dense<0.000000e+00> : vector<8x32xf32>
      %186 = tpu.matmul %183, %185, %cst_132 {dimension_numbers = #tpu.dot_dimension_numbers<[1], [0], [0], [1], [0, 0, 1, 1], [], []>} : vector<8x32xf32>, vector<32x32xf32>, vector<8x32xf32> -> vector<8x32xf32>
      %187 = arith.addf %176, %186 : vector<8x32xf32>
      %c3_133 = arith.constant 3 : index
      %c0_134 = arith.constant 0 : index
      %c0_135 = arith.constant 0 : index
      %188 = vector.load %arg12[%c3_133, %c0_134, %c0_135] : memref<4x8x32xf32, #tpu.memory_space<vmem>>, vector<1x8x32xf32>
      %189 = vector.shape_cast %188 : vector<1x8x32xf32> to vector<8x32xf32>
      %c3_136 = arith.constant 3 : index
      %c0_137 = arith.constant 0 : index
      %c0_138 = arith.constant 0 : index
      %190 = vector.load %arg11[%c3_136, %c0_137, %c0_138] : memref<4x8x1xf32, #tpu.memory_space<vmem>>, vector<1x8x1xf32>
      %191 = vector.shape_cast %190 : vector<1x8x1xf32> to vector<8x1xf32>
      %192 = tpu.reciprocal %191 {approx = true} : vector<8x1xf32> -> vector<8x1xf32>
      %193 = vector.broadcast %192 : vector<8x1xf32> to vector<8x32xf32>
      %194 = arith.mulf %189, %193 : vector<8x32xf32>
      %c3_139 = arith.constant 3 : index
      %c0_140 = arith.constant 0 : index
      %c0_141 = arith.constant 0 : index
      %195 = vector.load %arg6[%c3_139, %c0_140, %c0_141] : memref<4x32x32xf32, #tpu.memory_space<vmem>>, vector<1x32x32xf32>
      %196 = vector.shape_cast %195 : vector<1x32x32xf32> to vector<32x32xf32>
      %cst_142 = arith.constant dense<0.000000e+00> : vector<8x32xf32>
      %197 = tpu.matmul %194, %196, %cst_142 {dimension_numbers = #tpu.dot_dimension_numbers<[1], [0], [0], [1], [0, 0, 1, 1], [], []>} : vector<8x32xf32>, vector<32x32xf32>, vector<8x32xf32> -> vector<8x32xf32>
      %198 = arith.addf %187, %197 : vector<8x32xf32>
      %c0_143 = arith.constant 0 : index
      %c0_144 = arith.constant 0 : index
      %199 = vector.load %arg7[%c0_143, %c0_144] : memref<1x32xf32, #tpu.memory_space<vmem>>, vector<1x32xf32>
      %200 = vector.broadcast %199 : vector<1x32xf32> to vector<8x32xf32>
      %201 = arith.addf %198, %200 : vector<8x32xf32>
      %c0_145 = arith.constant 0 : index
      %c0_146 = arith.constant 0 : index
      %c0_147 = arith.constant 0 : index
      %202 = vector.load %arg8[%c0_145, %c0_146, %c0_147] : memref<1x8x32xf32, #tpu.memory_space<vmem>>, vector<1x8x32xf32>
      %203 = vector.shape_cast %202 : vector<1x8x32xf32> to vector<8x32xf32>
      %204 = vector.shape_cast %201 : vector<8x32xf32> to vector<1x8x32xf32>
      tpu.vector_store %arg8[%c0_145, %c0_146, %c0_147], %204 {strides = array<i32>} : memref<1x8x32xf32, #tpu.memory_space<vmem>>, vector<1x8x32xf32>,
    } else {
    }
    return
  }
  func.func @transform_0(%arg0: i32, %arg1: i32, %arg2: i32) -> (i32, i32, i32) {
    %c0_i32 = arith.constant 0 : i32
    %c0_i32_0 = arith.constant 0 : i32
    return %arg0, %arg1, %c0_i32 : i32, i32, i32
  }
  func.func @transform_1(%arg0: i32, %arg1: i32, %arg2: i32) -> (i32, i32, i32) {
    %c0_i32 = arith.constant 0 : i32
    %c0_i32_0 = arith.constant 0 : i32
    return %arg0, %arg2, %c0_i32 : i32, i32, i32
  }
  func.func @transform_2(%arg0: i32, %arg1: i32, %arg2: i32) -> (i32, i32) {
    %c0_i32 = arith.constant 0 : i32
    %c0_i32_0 = arith.constant 0 : i32
    %c0_i32_1 = arith.constant 0 : i32
    return %c0_i32, %c0_i32_0 : i32, i32
  }
  func.func @transform_3(%arg0: i32, %arg1: i32, %arg2: i32) -> (i32, i32, i32) {
    %c0_i32 = arith.constant 0 : i32
    %c0_i32_0 = arith.constant 0 : i32
    %c0_i32_1 = arith.constant 0 : i32
    %c0_i32_2 = arith.constant 0 : i32
    return %c0_i32, %c0_i32_0, %c0_i32_1 : i32, i32, i32
  }
  func.func @transform_4(%arg0: i32, %arg1: i32, %arg2: i32) -> (i32, i32) {
    %c0_i32 = arith.constant 0 : i32
    %c0_i32_0 = arith.constant 0 : i32
    %c0_i32_1 = arith.constant 0 : i32
    return %c0_i32, %c0_i32_0 : i32, i32
  }
  func.func @transform_5(%arg0: i32, %arg1: i32, %arg2: i32) -> (i32, i32, i32) {
    %c0_i32 = arith.constant 0 : i32
    %c0_i32_0 = arith.constant 0 : i32
    return %arg0, %arg1, %c0_i32 : i32, i32, i32
  }
}

</mosaic_0001>

<bundles_post_ra>
// kernel: tpu_custom_call.1
= control target key start
LH: loop header
LB: loop body
LE: loop exit
PB: predicated region body
PF: predicated region fallthrough
CT: control target
= control target key end

     0   :  { %s2941_s0 = inlined_call_operand.hbm [shape: f32[2,16,32], index: 0, kind: input, shape index: {}]   ;;  %s2942_s1 = inlined_call_operand.hbm [shape: f32[2,16,32], index: 1, kind: input, shape index: {}]   ;;  %s2943_s2 = inlined_call_operand.hbm [shape: f32[32,384], index: 2, kind: input, shape index: {}]   ;;  %s2944_s3 = inlined_call_operand.hbm [shape: f32[4,32,32], index: 3, kind: input, shape index: {}]   ;;  %s2945_s4 = inlined_call_operand.vmem [shape: f32[1,32], index: 4, kind: input, shape index: {}]   ;;  %s2946_s5 = inlined_call_operand.hbm [shape: f32[2,16,32], index: 5, kind: output, shape index: {}]  }
   0x1   :  { %2959 = sst [smem:[#allocation30_spill]] %s2943_s2 }
   0x2   :  { %2960 = sst [smem:[#allocation31_spill]] %s2944_s3 }
   0x3   :  { %2961 = sst [smem:[#allocation32_spill]] %s2945_s4 }
   0x4   :  { %2962 = sst [smem:[#allocation33_spill]] %s2946_s5 }
   0x5   :  { %10 = vsyncpa [#allocation7], 0 }
   0x6   :  { %12 = vsyncpa [#allocation7 + $0x1], 0 }
   0x7   :  { %13 = vsyncpa [#allocation10], 0 }
   0x8   :  { %15 = vsyncpa [#allocation10 + $0x1], 0 }
   0x9   :  { %16 = vsyncpa [#allocation13], 0 }
   0xa   :  { %17 = vsyncpa [#allocation8], 0 }
   0xb   :  { %19 = vsyncpa [#allocation8 + $0x1], 0  ;;  %s2487_s18 = smov 0   ;;  %s2489_s19 = smov 0  }
   0xc   :  { %s2491_s20 = smov 0   ;;  %s2493_s21 = smov 0  }
   0xd   :  { %s2495_s22 = smov 0   ;;  %s2497_s23 = smov 0  }
   0xe   :  { %s2499_s24 = smov 0   ;;  %s2501_s25 = smov 0  }
   0xf   :  { %s2503_s26 = smov 0   ;;  %s2505_s27 = smov 0  }
  0x10   :  { %s2507_s28 = smov 0   ;;  %s2509_s29 = smov 0  }
  0x11   :  { %s2511_s30 = smov 0  }
  0x12 LB: > { %2963 = sst [smem:[#allocation20_spill]] %s2395_s21  ;;  %s2553_s6 = sadd.s32 4294967295, %s2431_s30   ;;  %s2431_s30 = sphi %s2511_s30, %s25_s30   ;;  %s2427_s29 = sphi %s2509_s29, %s3019_s29   ;;  %s2423_s28 = sphi %s2507_s28, %s3018_s28   ;;  %s2419_s27 = sphi %s2505_s27, %s3017_s27   ;;  %s2415_s26 = sphi %s2503_s26, %s3016_s26   ;;  %s2411_s25 = sphi %s2501_s25, %s3015_s25   ;;  %s2407_s24 = sphi %s2499_s24, %s3014_s24   ;;  %s2403_s23 = sphi %s2497_s23, %s3013_s23   ;;  %s2399_s22 = sphi %s2495_s22, %s3012_s22   ;;  %s2395_s21 = sphi %s2493_s21, %s3011_s21   ;;  %s2391_s20 = sphi %s2491_s20, %s3010_s20   ;;  %s2387_s19 = sphi %s2489_s19, %s3009_s19   ;;  %s2383_s18 = sphi %s2487_s18, %s3008_s18  }
  0x13   : > { %2964 = sst [smem:[#allocation21_spill]] %s2407_s24  ;;  %p1806_p0 = scmp.ge.s32.totalorder %s2431_s30, 1 }
  0x14   : > { %2965 = sst [smem:[#allocation22_spill]] %s2411_s25  ;;  %p2957_p1 = scmp.eq.s32.totalorder %s2553_s6, 0 }
  0x15   : > { %2966 = sst [smem:[#allocation23_spill]] %s2415_s26  ;;  %p196_p2 = scmp.lt.s32.totalorder %s2431_s30, 9 }
  0x16   : > { %s2433_s8 = smov [#allocation11]   ;;  %s2434_s11 = smov [#allocation12]  }
  0x17   : > { %p2558_p3 = pnand %p1806_p0, %p196_p2  ;;  %s208_s9 = sshll.u32 %s2433_s8, 4  ;;  %s209_s9 = int_to_ptr.vmem [resolvable:$true] %s208_s9 }
  0x18   : > { %s221_s12 = sshll.u32 %s2434_s11, 4  ;;  %s2186_s13 = scalar_lea.vmem %s209_s9, 1536  ;;  %s222_s12 = int_to_ptr.vmem [resolvable:$true] %s221_s12 }
  0x19   : > { %p1998_p4 = pneg %p2558_p3  ;;  %p2187_p7 = scmp.ne.s32.totalorder %s209_s9, %s2186_s13 }
  0x1a   : > { %p2194_p10 = scmp.lt.s32.totalorder %s209_s9, %s209_s9  ;;  %p2195_p11 = scmp.lt.s32.totalorder %s2186_s13, %s2186_s13 }
  0x1b   : > { %p2566_p5 = pnand %p1998_p4, %p2957_p1 }
  0x1c   : > { %p2196_p12 = por %p2195_p11, %p2194_p10 }
  0x1d   : > { %p2177_p6 = pneg %p2566_p5 }
  0x1f   : > { %p2189_p8 = pnand %p2187_p7, %p2177_p6 }
  0x21   : > { %p2190_p9 = pneg %p2189_p8 }
  0x23   : > { %p2197_p13 = pnand %p2196_p12, %p2190_p9 }
  0x25   : > { %2200 = shalt.err (!%p2197_p13)
}
  0x26   : > { %s2435_s14 = smov 384   ;;  %s2436_s15 = smov 24  }
  0x27   : > { %s2969_s2 = sld [smem:[#allocation30_spill]]  ;;  %s2212_s8 = scalar_lea.vmem %s222_s12, 2048 }
  0x28   : > { %p2213_p0 = scmp.ne.s32.totalorder %s222_s12, %s2212_s8  ;;  %p2220_p7 = scmp.lt.s32.totalorder %s222_s12, %s222_s12 }
  0x29   : > { %p2221_p8 = scmp.lt.s32.totalorder %s2212_s8, %s2212_s8 }
  0x2a   : > { %p2215_p2 = pnand %p2213_p0, %p2177_p6 }
  0x2b   : > { %p2222_p10 = por %p2221_p8, %p2220_p7 }
  0x2c   : > { %p2216_p4 = pneg %p2215_p2 }
  0x2d   : > { %2001 = dma.hbm_to_vmem [thread:$0]  (!%p2566_p5), %s2969_s2, 1536, %s209_s9, [#allocation10], %s2435_s14, %s2435_s14, %s2436_s15  }
  0x2e   : > { %p2223_p9 = pnand %p2222_p10, %p2216_p4 }
  0x30   : > { %2226 = shalt.err (!%p2223_p9)
}
  0x31   : > { %s2437_s11 = smov 128   ;;  %s2438_s9 = smov 8  }
  0x32   : > { %s2970_s3 = sld [smem:[#allocation31_spill]]  ;;  %s1805_s15 = sadd.s32 4294967294, %s2431_s30  }
  0x33   : > { %s37_s16 = sadd.s32 1, %s2419_s27  ;;  %s40_s17 = sadd.s32 1, %s2423_s28 }
  0x34   : > { %p38_p6 = scmp.ge.s32.totalorder %s37_s16, 2  ;;  %s44_s8 = sadd.s32 1, %s2427_s29 }
  0x35   : > { %s53_s2 = sadd.s32 1, %s2403_s23  ;;  %p2958_p11 = scmp.eq.s32.totalorder %s2431_s30, 0 }
  0x36   : > { %s3021_s16 = smov (%p38_p6, %s37_s16), 0  ;;  %s3023_s17 = smov (!%p38_p6, %s40_s17), %s2423_s28 }
  0x37   : > { %2971 = sst [smem:[#allocation24_spill]] %s3021_s16  ;;  %p42_p12 = scmp.ge.s32.totalorder %s3023_s17, 2 }
  0x38   : > { %2004 = dma.hbm_to_vmem [thread:$0]  (!%p2566_p5), %s2970_s3, 2048, %s222_s12, [#allocation13], %s2437_s11, %s2437_s11, %s2438_s9  }
  0x39   : > { %p60_p5 = scmp.ne.s32.totalorder %s2403_s23, %s2399_s22  ;;  %p66_p13 = scmp.ne.s32.totalorder %s2399_s22, %s2395_s21 }
  0x3a   : > { %s77_s12 = ssub.s32 %s2419_s27, %s3021_s16  ;;  %s3025_s17 = smov (%p42_p12, %s3023_s17), 0 }
  0x3b   : > { %p2606_p0 = por %p2958_p11, %p60_p5  ;;  %2973 = sst [smem:[#allocation25_spill]] %s3025_s17 }
  0x3c   : > { %s3027_s8 = smov (!%p42_p12, %s44_s8), %s2427_s29  ;;  %s49_s11 = ssub.s32 %s2423_s28, %s3025_s17 }
  0x3d   : > { %p2622_p2 = por %p2957_p1, %p66_p13  ;;  %p46_p4 = scmp.ge.s32.totalorder %s3027_s8, 2 }
  0x3e   : > { %p183_p7 = scmp.eq.s32.totalorder %s2553_s6, 7  ;;  %p189_p8 = scmp.eq.s32.totalorder %s1805_s15, 7 }
  0x3f   : > { %s2974_s9 = scalar_select %p2622_p2, 1, 0 }
  0x40   : > { %p2018_p10 = scmp.lt.s32.totalorder %s2431_s30, 8  ;;  %s3029_s8 = smov (%p46_p4, %s3027_s8), 0 }
  0x41   : > { %2975 = sst [smem:[#allocation26_spill]] %s2974_s9  ;;  %p2633_p9 = por %p183_p7, %p60_p5 }
  0x42   : > { %2976 = sst [smem:[#allocation27_spill]] %s3029_s8  ;;  %p2640_p6 = por %p189_p8, %p66_p13 }
  0x43   : > { %s2977_s13 = scalar_select %p2633_p9, 1, 0 }
  0x44   : > { %s2979_s14 = scalar_select %p2640_p6, 1, 0 }
  0x45   : > { %2978 = sst [smem:[#allocation28_spill]] %s2977_s13  ;;  %s48_s3 = ssub.s32 %s2427_s29, %s3029_s8 }
  0x46   : > { %2980 = sst [smem:[#allocation29_spill]] %s2979_s14  ;;  %s238_s17 = sand.u32 1, %s2403_s23  }
  0x47   : > { %s50_s15 = sor.u32 %s49_s11, %s48_s3  ;;  %s2647_s16 = sor.u32 %s77_s12, %s48_s3 }
  0x48   : > { %p51_p12 = scmp.eq.s32.totalorder %s50_s15, 0  ;;  %s1810_s5 = sshll.u32 %s238_s17, 3 }
  0x49   : > { %s1811_s13 = sshll.u32 %s2427_s29, 1  ;;  %s242_s26 = scalar_lea.vmem [#allocation6], %s1810_s5 }
  0x4a   : > { %s2651_s25 = scalar_select %p51_p12, %s2403_s23, %s53_s2  }
  0x4b   : > { %s247_s21 = sadd.s32 %s2423_s28, %s1811_s13  ;;  %s251_s4 = sshll.u32 %s242_s26, 4  ;;  %s252_s4 = int_to_ptr.vmem [resolvable:$true] %s251_s4 }
  0x4c   : > { %s1812_s24 = sshll.u32 %s247_s21, 7  ;;  %p2662_p5 = pnand %p2018_p10, %p2606_p0 }
  0x4d   : > { %s249_s8 = scalar_lea.hbm %s2941_s0, %s1812_s24  ;;  %s267_s12 = sadd.s32 %s2419_s27, %s1811_s13 }
  0x4e   : > { %s239_s2 = scalar_lea.sflag [#allocation7], %s238_s17  ;;  %p2229_p13 = pneg %p2662_p5 }
  0x4f   : > { %s2240_s11 = scalar_lea.vmem %s252_s4, 128  ;;  %s2439_s5 = smov [#allocation6]  }
  0x50   : > { %p2241_p7 = scmp.ne.s32.totalorder %s252_s4, %s2240_s11  ;;  %s2245_s21 = sshll.u32 %s2439_s5, 4  ;;  %s2246_s21 = int_to_ptr.vmem [resolvable:$false] %s2245_s21 }
  0x51   : > { %s2247_s26 = scalar_lea.vmem %s2246_s21, 256  ;;  %p2248_p1 = scmp.lt.s32.totalorder %s252_s4, %s2246_s21 }
  0x52   : > { %p2243_p8 = pnand %p2241_p7, %p2229_p13  ;;  %p2249_p11 = scmp.lt.s32.totalorder %s2247_s26, %s2240_s11 }
  0x54   : > { %p2244_p12 = pneg %p2243_p8  ;;  %p2250_p4 = por %p2249_p11, %p2248_p1 }
  0x56   : > { %p2251_p0 = pnand %p2250_p4, %p2244_p12 }
  0x58   : > { %2254 = shalt.err (!%p2251_p0)
}
  0x59   : > { %2008 = dma.hbm_to_vmem [thread:$0]  (!%p2662_p5), %s249_s8, 128, %s252_s4, %s239_s2  }
  0x5a   : > { %s81_s24 = sadd.s32 1, %s2391_s20  ;;  %p88_p13 = scmp.ne.s32.totalorder %s2391_s20, %s2387_s19 }
  0x5b   : > { %p2982_p1 = scmp.eq.s32.totalorder %s2647_s16, 0  ;;  %p2983_p11 = scmp.eq.s32.totalorder %s2431_s30, 0 }
  0x5c   : > { %p94_p7 = scmp.ne.s32.totalorder %s2387_s19, %s2383_s18  ;;  %s258_s10 = sand.u32 1, %s2431_s30  }
  0x5d   : > { %s2677_s17 = scalar_select %p2982_p1, %s2391_s20, %s81_s24  }
  0x5e   : > { %p90_p4 = por %p88_p13, %p2983_p11  ;;  %s260_s9 = sand.u32 1, %s2391_s20  }
  0x5f   : > { %p2984_p8 = scmp.eq.s32.totalorder %s2553_s6, 0  ;;  %s1813_s14 = sshll.u32 %s260_s9, 3 }
  0x60   : > { %s1815_s15 = sshll.u32 %s267_s12, 7  ;;  %s262_s8 = scalar_lea.vmem [#allocation9], %s1813_s14 }
  0x61   : > { %p2687_p12 = por %p94_p7, %p2984_p8  ;;  %s269_s4 = scalar_lea.hbm %s2942_s1, %s1815_s15 }
  0x62   : > { %s271_s16 = sshll.u32 %s262_s8, 4  ;;  %p2696_p5 = pnand %p2018_p10, %p90_p4  ;;  %s272_s16 = int_to_ptr.vmem [resolvable:$true] %s271_s16 }
  0x63   : > { %s259_s18 = scalar_lea.sflag [#allocation10], %s258_s10  ;;  %s2268_s5 = scalar_lea.vmem %s272_s16, 128 }
  0x64   : > { %p2257_p0 = pneg %p2696_p5  ;;  %p2269_p13 = scmp.ne.s32.totalorder %s272_s16, %s2268_s5 }
  0x65   : > { %s2440_s12 = smov [#allocation9]  }
  0x66   : > { %p2271_p1 = pnand %p2269_p13, %p2257_p0  ;;  %s2273_s21 = sshll.u32 %s2440_s12, 4  ;;  %s2274_s21 = int_to_ptr.vmem [resolvable:$false] %s2273_s21 }
  0x67   : > { %s2275_s26 = scalar_lea.vmem %s2274_s21, 256  ;;  %p2276_p7 = scmp.lt.s32.totalorder %s272_s16, %s2274_s21 }
  0x68   : > { %p2272_p11 = pneg %p2271_p1  ;;  %p2277_p8 = scmp.lt.s32.totalorder %s2275_s26, %s2268_s5 }
  0x6a   : > { %p2278_p6 = por %p2277_p8, %p2276_p7 }
  0x6c   : > { %p2279_p10 = pnand %p2278_p6, %p2272_p11 }
  0x6e   : > { %2282 = shalt.err (!%p2279_p10)
}
  0x6f   : > { %2011 = dma.hbm_to_vmem [thread:$0]  (!%p2696_p5), %s269_s4, 128, %s272_s16, %s259_s18  }
  0x70   : > { %280 = sbr.rel (%p2558_p3) target bundleno = 1842 (0x732), region = 40  ;;  %s2707_s10 = sand.u32 (!%p2558_p3), 1, %s2399_s22  }
  0x71   : > { %s1817_s9 = sshll.u32 (!%p2558_p3), %s2707_s10, 3  ;;  %s283_s14 = scalar_lea.sflag (!%p2558_p3), [#allocation7], %s2707_s10 }
  0x72   : > { %s2711_s15 = scalar_lea.vmem (!%p2558_p3), [#allocation6], %s1817_s9 }
  0x75   : > { %2362 = dma.done.wait (%p2622_p2), %s283_s14, 128  }
  0x76   : > { %2364 = vsyncadd (%p2622_p2), %s283_s14, 4294967168  ;;  %s291_s7 = sand.u32 1, %s2553_s6   ;;  %s293_s3 = sand.u32 1, %s2387_s19  }
  0x77   : > { %s2719_s11 = sshll.u32 %s293_s3, 3  ;;  %s292_s4 = scalar_lea.sflag [#allocation10], %s291_s7 }
  0x78   : > { %s295_s8 = scalar_lea.vmem [#allocation9], %s2719_s11 }
  0x79   : > { %2366 = dma.done.wait (%p2687_p12), %s292_s4, 128  }
  0x7a   : > { %2368 = vsyncadd (%p2687_p12), %s292_s4, 4294967168  ;;  %p2988_p3 = scmp.eq.s32.totalorder %s2553_s6, 0 }
  0x7c   : > { %2370 = dma.done.wait (%p2988_p3), [#allocation10], 1536   ;;  %p2989_p2 = pmov %p2988_p3 }
  0x7e   : > { %2372 = vsyncadd (%p2989_p2), [#allocation10], 4294965760  ;;  %p2990_p6 = pmov %p2989_p2 }
  0x7f   : > { %p2991_p4 = pmov %p2989_p2 }
  0x80   : > { %2374 = dma.done.wait (%p2990_p6), [#allocation13], 2048  }
  0x81   : > { %2376 = vsyncadd (%p2991_p4), [#allocation13], 4294965248  ;;  %s2734_s16 = scalar_lea.vmem [#allocation14], %s1817_s9  ;;  %s2992_s2 = sld [smem:[#allocation21_spill]] }
  0x87   : > { %p1822_p5 = scmp.ne.s32.totalorder %s2992_s2, 0 }
  0x88   : > { %s2444_s6 = smov (!%p1822_p5), 32   ;;  %s2445_s13 = smov (!%p1822_p5), 96  }
  0x89   : > { %338 = sbr.rel (%p1822_p5) target bundleno = 464 (0x1d0), region = 60  ;;  %s2446_s18 = smov (!%p1822_p5), 64  }
  0x8e   : > { %vm435_vm0 = vcmask 7168   ;;  %v343_v0 = vld [vmem:[#allocation11 + $0x48] sm:$0xff]  ;;  %v2441_v1 = vmov 0.0   ;;  %v2442_v2 = vmov -inf   ;;  %v342_v3 = vld [vmem:[#allocation11 + $0x30] sm:$0xff]  ;;  %vm344_vm1 = vcmask 261120  }
  0x8f   : > { %1889 = vmatprep.subr.mxu0 %v2441_v1  ;;  %436 = vst.msk [vmem:[#allocation3] sm:$0xff] %vm435_vm0, %v2442_v2  ;;  %437 = vst.msk [vmem:[#allocation3 + $0x8] sm:$0xff] %vm435_vm0, %v2442_v2  ;;  %vm2443_vm2 = vmmov 0   ;;  %v341_v4 = vld [vmem:[#allocation11 + $0x18] sm:$0xff]  ;;  %v340_v5 = vld [vmem:[#allocation11] sm:$0xff] }
  0x90   : > { %438 = vst.msk [vmem:[#allocation3 + $0x10] sm:$0xff] %vm435_vm0, %v2442_v2  ;;  %439 = vst.msk [vmem:[#allocation3 + $0x18] sm:$0xff] %vm435_vm0, %v2442_v2  ;;  %1890 = vmatpush3.msra.mxu0 %v343_v0  ;;  %1897 = vmatprep.mubr.msk.f32.mxu0 %vm2443_vm2, %v2441_v1  ;;  %v339_v6 = vld [vmem:[%s2711_s15] sm:$0xff] }
  0x91   : > { %440 = vst.msk [vmem:[#allocation4] sm:$0xff] %vm435_vm0, %v2441_v1  ;;  %441 = vst.msk [vmem:[#allocation4 + $0x8] sm:$0xff] %vm435_vm0, %v2441_v1  ;;  %1891 = vmatprep.subr.mxu0 %v2441_v1 }
  0x92   : > { %442 = vst.msk [vmem:[#allocation4 + $0x10] sm:$0xff] %vm435_vm0, %v2441_v1  ;;  %443 = vst.msk [vmem:[#allocation4 + $0x18] sm:$0xff] %vm435_vm0, %v2441_v1  ;;  %1892 = vmatpush3.msra.mxu0 %v342_v3 }
  0x93   : > { %444 = vst.msk [vmem:[#allocation5] sm:$0xff] %vm344_vm1, %v2441_v1  ;;  %445 = vst.msk [vmem:[#allocation5 + $0x8] sm:$0xff] %vm344_vm1, %v2441_v1  ;;  %1893 = vmatprep.subr.mxu0 %v2441_v1 }
  0x94   : > { %446 = vst.msk [vmem:[#allocation5 + $0x10] sm:$0xff] %vm344_vm1, %v2441_v1  ;;  %447 = vst.msk [vmem:[#allocation5 + $0x18] sm:$0xff] %vm344_vm1, %v2441_v1  ;;  %1894 = vmatpush3.msra.mxu0 %v341_v4 }
  0x95   : > { %1895 = vmatprep.subr.mxu0 %v2441_v1 }
  0x96   : > { %1896 = vmatpush3.msra.mxu0 %v340_v5 }
  0x97   : > { %1898 = vmatmul.mubr.msk.f32.vlgmr.msra.gmra.mxu0 %vm344_vm1, %v339_v6 }
 0x157   : > { %v414_v7 = vpop.f32.mrf.mxu0 }
 0x158   : > { %418 = vst.msk [vmem:[#allocation2] sm:$0xff] %vm344_vm1, %v414_v7  ;;  %430 = vrot.lane.b32.xlu1 %v414_v7, %s2444_s6  ;;  %420 = vrot.lane.b32.xlu0 %v414_v7, %s2445_s13 }
 0x159   : > { %v1899_v8 = vpop.f32.mrf.mxu0 }
 0x15c   : > { %425 = vrot.lane.b32.xlu0 %v414_v7, %s2446_s18 }
 0x1ca   : > { %v431_v9 = vpop.permute.xlu1 %430  ;;  %v421_v10 = vpop.permute.xlu0 %420 }
 0x1cb   : > { %434 = vst.msk [vmem:[#allocation2 + $0x18] sm:$0xff] %vm344_vm1, %v431_v9  ;;  %424 = vst.msk [vmem:[#allocation2 + $0x8] sm:$0xff] %vm344_vm1, %v421_v10 }
 0x1ce   : > { %v426_v11 = vpop.permute.xlu0 %425 }
 0x1cf   : > { %429 = vst.msk [vmem:[#allocation2 + $0x10] sm:$0xff] %vm344_vm1, %v426_v11 }
 0x1d0 PF: > { %v456_v12 = vld [vmem:[#allocation11 + $0x58] sm:$0xff]  ;;  %v455_v13 = vld [vmem:[#allocation11 + $0x50] sm:$0xff]  ;;  %v454_v14 = vld [vmem:[#allocation11 + $0x40] sm:$0xff]  ;;  %v2447_v16 = vmov 0.0   ;;  %vm457_vm3 = vcmask 261120   ;;  %vm2448_vm4 = vmmov 0  }
 0x1d1   : > { %485 = vmatprep.subr.mxu0 %v456_v12  ;;  %v453_v15 = vld [vmem:[#allocation11 + $0x38] sm:$0xff]  ;;  %525 = vmatprep.mubr.f32.mxu0 %v2447_v16  ;;  %v452_v17 = vld [vmem:[#allocation11 + $0x28] sm:$0xff]  ;;  %v451_v18 = vld [vmem:[#allocation11 + $0x20] sm:$0xff]  ;;  %s2449_s5 = smov 32   ;;  %s2450_s12 = smov 96   ;;  %vm610_vm5 = vcmask 64512  }
 0x1d2   : > { %486 = vmatpush1.msra.mxu0 %v455_v13  ;;  %1900 = vmatprep.subr.mxu1 %v2447_v16  ;;  %v450_v19 = vld [vmem:[#allocation11 + $0x10] sm:$0xff]  ;;  %v449_v20 = vld [vmem:[#allocation11 + $0x8] sm:$0xff]  ;;  %v532_v23 = vld [vmem:[#allocation2] sm:$0xff]  ;;  %s2451_s21 = smov 64   ;;  %v2452_v34 = vmov 0   ;;  %vm632_vm6 = vcmask 7168  }
 0x1d3   : > { %487 = vmatprep.subr.mxu0 %v454_v14  ;;  %v448_v21 = vld [vmem:[%s295_s8] sm:$0xff]  ;;  %1902 = vmatprep.mubr.msk.f32.mxu1 %vm2448_vm4, %v2447_v16  ;;  %v718_v26 = vld [vmem:[#allocation2 + $0x8] sm:$0xff]  ;;  %v609_v44 = vld [vmem:[#allocation3] sm:$0xff]  ;;  %s2993_s26 = sld [smem:[#allocation21_spill]] }
 0x1d4   : > { %488 = vmatpush1.msra.mxu0 %v453_v15  ;;  %v1101_v30 = vld [vmem:[#allocation2 + $0x18] sm:$0xff]  ;;  %2147 = vset.pattern.permute.xlu0 %v2452_v34  ;;  %v797_v50 = vld [vmem:[#allocation3 + $0x8] sm:$0xff]  ;;  %v989_v53 = vld [vmem:[#allocation3 + $0x10] sm:$0xff] }
 0x1d5   : > { %489 = vmatprep.subr.mxu0 %v452_v17  ;;  %2148 = vset.pattern.permute.xlu1 %v2452_v34  ;;  %v1180_v57 = vld [vmem:[#allocation3 + $0x18] sm:$0xff] }
 0x1d6   : > { %490 = vmatpush1.msra.mxu0 %v451_v18  ;;  %v910_v28 = vld [vmem:[#allocation2 + $0x10] sm:$0xff] }
 0x1d7   : > { %491 = vmatprep.subr.mxu0 %v450_v19 }
 0x1d8   : > { %492 = vmatpush1.msra.mxu0 %v449_v20 }
 0x1d9   : > { %1824 = vmatmul.mubr.msk.f32.vlgmr.msra.gmra.mxu0 %vm457_vm3, %v448_v21  ;;  %1910 = vmatprep.subr.mxu0 %v2447_v16  ;;  %p1837_p12 = scmp.ne.s32.totalorder %s2993_s26, 1 }
 0x1da   : > { %1912 = vmatprep.mubr.msk.f32.mxu0 %vm2448_vm4, %v2447_v16  ;;  %s2994_s14 = sld [smem:[#allocation32_spill]] (!%p1837_p12) }
 0x299   : > { %v527_v22 = vpop.f32.mrf.mxu0 }
 0x29a   : > { %1102 = vrot.lane.b32.xlu1 %v527_v22, %s2449_s5  ;;  %719 = vrot.lane.b32.xlu0 %v527_v22, %s2450_s12 }
 0x29b   : > { %1901 = vmatpush3.xpose.msk.msra.mxu1 %vm457_vm3, %v527_v22  ;;  %v2761_v24 = vpop.f32.mrf.mxu0 }
 0x29c   : > { %1905 = vmatprep.subr.mxu1 %v2447_v16 }
 0x29e   : > { %911 = vrot.lane.b32.xlu0 %v527_v22, %s2451_s21  ;;  %1903 = vmatmul.mubr.msk.f32.vlgmr.msra.gmra.mxu1 %vm457_vm3, %v532_v23 }
 0x29f   : > { %1906 = vmatpush3.msra.mxu1 %v2761_v24  ;;  %1907 = vmatprep.mubr.msk.f32.mxu1 %vm2448_vm4, %v2447_v16 }
 0x2a0   : > { %1915 = vmatprep.subr.mxu1 %v2447_v16 }
 0x30c   : > { %v720_v25 = vpop.permute.xlu0 %719  ;;  %v1103_v29 = vpop.permute.xlu1 %1102 }
 0x30d   : > { %1911 = vmatpush3.xpose.msk.msra.mxu0 %vm457_vm3, %v720_v25 }
 0x30e   : > { %1920 = vmatprep.subr.mxu0 %v2447_v16 }
 0x310   : > { %1913 = vmatmul.mubr.msk.f32.vlgmr.msra.gmra.mxu0 %vm457_vm3, %v718_v26  ;;  %v912_v27 = vpop.permute.xlu0 %911 }
 0x311   : > { %1921 = vmatpush3.xpose.msk.msra.mxu0 %vm457_vm3, %v912_v27  ;;  %1922 = vmatprep.mubr.msk.f32.mxu0 %vm2448_vm4, %v2447_v16 }
 0x312   : > { %1930 = vmatprep.subr.mxu0 %v2447_v16 }
 0x314   : > { %1923 = vmatmul.mubr.msk.f32.vlgmr.msra.gmra.mxu0 %vm457_vm3, %v910_v28 }
 0x315   : > { %1931 = vmatpush3.xpose.msk.msra.mxu0 %vm457_vm3, %v1103_v29  ;;  %1932 = vmatprep.mubr.msk.f32.mxu0 %vm2448_vm4, %v2447_v16  ;;  %v626_v29 = vld [vmem:[#allocation4] sm:$0xff] }
 0x318   : > { %1933 = vmatmul.mubr.msk.f32.vlgmr.msra.gmra.mxu0 %vm457_vm3, %v1101_v30 }
 0x35e   : > { %v605_v31 = vpop.f32.mrf.mxu1 }
 0x35f   : > { %v611_v32 = vsel %vm610_vm5, %v605_v31, -inf }
 0x360   : > { %612 = vmax.xlane.f32.xlu1 %v611_v32  ;;  %v1904_v33 = vpop.f32.mrf.mxu1 }
 0x361   : > { %v634_v33 = vld [vmem:[#allocation5] sm:$0xff] }
 0x3d0   : > { %v2782_v35 = vpop.f32.mrf.mxu0 }
 0x3d1   : > { %v798_v36 = vsel %vm610_vm5, %v2782_v35, -inf }
 0x3d2   : > { %799 = vmax.xlane.f32.xlu0 %v798_v36  ;;  %v1914_v37 = vpop.f32.mrf.mxu0 }
 0x3d4   : > { %v2786_v38 = vpop.f32.mrf.mxu0 }
 0x3d5   : > { %v990_v39 = vsel %vm610_vm5, %v2786_v38, -inf }
 0x3d6   : > { %991 = vmax.xlane.f32.xlu0 %v990_v39  ;;  %v1924_v40 = vpop.f32.mrf.mxu0  ;;  %v814_v39 = vld [vmem:[#allocation4 + $0x8] sm:$0xff] }
 0x3d8   : > { %v2790_v41 = vpop.f32.mrf.mxu0 }
 0x3d9   : > { %v1181_v42 = vsel %vm610_vm5, %v2790_v41, -inf }
 0x3da   : > { %1182 = vmax.xlane.f32.xlu1 %v1181_v42  ;;  %v1934_v43 = vpop.f32.mrf.mxu0  ;;  %v1006_v42 = vld [vmem:[#allocation4 + $0x10] sm:$0xff] }
 0x3e9   : > { %v613_v45 = vpop.xlane.xlu1 %612 }
 0x3ea   : > { %v614_v46 = vmax.f32 %v609_v44, %v613_v45 }
 0x3ec   : > { %v615_v47 = vsub.f32 %v609_v44, %v614_v46  ;;  %716 = vst.msk [vmem:[#allocation3] sm:$0xff] %vm632_vm6, %v614_v46  ;;  %620 = vperm.xlu0 %2147, %v614_v46   ;;  %v1197_v46 = vld [vmem:[#allocation4 + $0x18] sm:$0xff] }
 0x3ee   : > { %v616_v48 = vmul.f32 1.442695, %v615_v47 }
 0x3f0   : > { %2149 = vpow2.f32 %v616_v48 }
 0x3fd   : > { %v2795_v49 = vpop.eup %2149 }
 0x3fe   : > { %637 = vperm.xlu0 %2147, %v2795_v49   ;;  %v627_v30 = vmul.f32 %v2795_v49, %v626_v29 }
 0x45b   : > { %v800_v51 = vpop.xlane.xlu0 %799 }
 0x45c   : > { %v801_v52 = vmax.f32 %v797_v50, %v800_v51  ;;  %v822_v51 = vld [vmem:[#allocation5 + $0x8] sm:$0xff] }
 0x45e   : > { %908 = vst.msk [vmem:[#allocation3 + $0x8] sm:$0xff] %vm632_vm6, %v801_v52  ;;  %807 = vperm.xlu1 %2148, %v801_v52   ;;  %v802_v55 = vsub.f32 %v797_v50, %v801_v52 }
 0x45f   : > { %v992_v54 = vpop.xlane.xlu0 %991 }
 0x460   : > { %v993_v56 = vmax.f32 %v989_v53, %v992_v54  ;;  %v803_v60 = vmul.f32 1.442695, %v802_v55 }
 0x462   : > { %v994_v58 = vsub.f32 %v989_v53, %v993_v56  ;;  %1099 = vst.msk [vmem:[#allocation3 + $0x10] sm:$0xff] %vm632_vm6, %v993_v56  ;;  %999 = vperm.xlu1 %2148, %v993_v56   ;;  %v1014_v53 = vld [vmem:[#allocation5 + $0x10] sm:$0xff] }
 0x463   : > { %v1183_v59 = vpop.xlane.xlu1 %1182 }
 0x464   : > { %v995_v61 = vmul.f32 1.442695, %v994_v58  ;;  %v1184_v62 = vmax.f32 %v1180_v57, %v1183_v59  ;;  %v1205_v58 = vld [vmem:[#allocation5 + $0x18] sm:$0xff] }
 0x466   : > { %2151 = vpow2.f32 %v995_v61  ;;  %v1185_v63 = vsub.f32 %v1180_v57, %v1184_v62  ;;  %1290 = vst.msk [vmem:[#allocation3 + $0x18] sm:$0xff] %vm632_vm6, %v1184_v62  ;;  %1190 = vperm.xlu1 %2148, %v1184_v62  }
 0x467   : > { %v621_v0 = vpop.permute.xlu0 %620  ;;  %2153 = vpow2.f32 %v803_v60 }
 0x468   : > { %v623_v1 = vsub.f32 %v605_v31, %v621_v0  ;;  %v1186_v26 = vmul.f32 1.442695, %v1185_v63 }
 0x46a   : > { %v624_v2 = vmul.f32 1.442695, %v623_v1  ;;  %830 = vrot.lane.b32.xlu1 %v2761_v24, %s2450_s12 }
 0x46c   : > { %2155 = vpow2.f32 %v624_v2 }
 0x46e   : > { %1021 = vrot.lane.b32.xlu1 %v2761_v24, %s2451_s21 }
 0x472   : > { %1212 = vrot.lane.b32.xlu1 %v2761_v24, %s2449_s5 }
 0x473   : > { %v2807_v3 = vpop.eup %2151 }
 0x474   : > { %1017 = vperm.xlu0 %2147, %v2807_v3   ;;  %v2154_v4 = vpop.eup %2153  ;;  %v1007_v44 = vmul.f32 %v2807_v3, %v1006_v42 }
 0x475   : > { %v815_v40 = vmul.f32 %v2154_v4, %v814_v39 }
 0x476   : > { %825 = vperm.xlu1 %2148, %v2154_v4  }
 0x479   : > { %v2156_v5 = vpop.eup %2155 }
 0x47a   : > { %1908 = vmatmul.mubr.msk.f32.vlgmr.msra.gmra.mxu1 %vm610_vm5, %v2156_v5  ;;  %v628_v6 = vsel %vm610_vm5, %v2156_v5, 0.0 }
 0x47b   : > { %1917 = vmatprep.mubr.msk.f32.mxu1 %vm2448_vm4, %v2447_v16 }
 0x49a   : > { %629 = vadd.xlane.f32.xlu1 %v628_v6 }
 0x4d9   : > { %v808_v7 = vpop.permute.xlu1 %807 }
 0x4da   : > { %v810_v8 = vsub.f32 %v2782_v35, %v808_v7 }
 0x4dc   : > { %v811_v9 = vmul.f32 1.442695, %v810_v8 }
 0x4dd   : > { %v1000_v10 = vpop.permute.xlu1 %999 }
 0x4de   : > { %2157 = vpow2.f32 %v811_v9  ;;  %v1002_v11 = vsub.f32 %v2786_v38, %v1000_v10 }
 0x4e0   : > { %v1003_v12 = vmul.f32 1.442695, %v1002_v11 }
 0x4e1   : > { %v1191_v13 = vpop.permute.xlu1 %1190 }
 0x4e2   : > { %2159 = vpow2.f32 %v1003_v12  ;;  %v1193_v14 = vsub.f32 %v2790_v41, %v1191_v13 }
 0x4e4   : > { %v1194_v15 = vmul.f32 1.442695, %v1193_v14 }
 0x4e5   : > { %v831_v17 = vpop.permute.xlu1 %830 }
 0x4e6   : > { %2161 = vpow2.f32 %v1194_v15  ;;  %1916 = vmatpush3.msra.mxu1 %v831_v17 }
 0x4e7   : > { %1925 = vmatprep.subr.mxu1 %v2447_v16  ;;  %2163 = vpow2.f32 %v1186_v26 }
 0x4e9   : > { %v1022_v18 = vpop.permute.xlu1 %1021 }
 0x4eb   : > { %v2158_v19 = vpop.eup %2157 }
 0x4ec   : > { %1918 = vmatmul.mubr.msk.f32.vlgmr.msra.gmra.mxu1 %vm610_vm5, %v2158_v19  ;;  %v816_v20 = vsel %vm610_vm5, %v2158_v19, 0.0 }
 0x4ed   : > { %1926 = vmatpush3.msra.mxu1 %v1022_v18  ;;  %817 = vadd.xlane.f32.xlu0 %v816_v20  ;;  %v1213_v22 = vpop.permute.xlu1 %1212 }
 0x4ee   : > { %1927 = vmatprep.mubr.msk.f32.mxu1 %vm2448_vm4, %v2447_v16  ;;  %1935 = vmatprep.subr.mxu1 %v2447_v16 }
 0x4ef   : > { %v2160_v21 = vpop.eup %2159 }
 0x4f0   : > { %1928 = vmatmul.mubr.msk.f32.vlgmr.msra.gmra.mxu1 %vm610_vm5, %v2160_v21  ;;  %v1008_v23 = vsel %vm610_vm5, %v2160_v21, 0.0 }
 0x4f1   : > { %1936 = vmatpush3.msra.mxu1 %v1213_v22  ;;  %1009 = vadd.xlane.f32.xlu0 %v1008_v23  ;;  %v826_v28 = vpop.permute.xlu1 %825 }
 0x4f2   : > { %1937 = vmatprep.mubr.msk.f32.mxu1 %vm2448_vm4, %v2447_v16  ;;  %v638_v16 = vpop.permute.xlu0 %637  ;;  %v828_v52 = vmul.f32 %v826_v28, %v822_v51 }
 0x4f3   : > { %v2162_v24 = vpop.eup %2161  ;;  %v640_v34 = vmul.f32 %v638_v16, %v634_v33 }
 0x4f4   : > { %1938 = vmatmul.mubr.msk.f32.vlgmr.msra.gmra.mxu1 %vm610_vm5, %v2162_v24  ;;  %v1199_v25 = vsel %vm610_vm5, %v2162_v24, 0.0  ;;  %v2164_v27 = vpop.eup %2163 }
 0x4f5   : > { %1200 = vadd.xlane.f32.xlu1 %v1199_v25  ;;  %v1198_v48 = vmul.f32 %v2164_v27, %v1197_v46 }
 0x4f6   : > { %v1018_v38 = vpop.permute.xlu0 %1017 }
 0x4f7   : > { %v1020_v57 = vmul.f32 %v1018_v38, %v1014_v53 }
 0x507   : > { %1208 = vperm.xlu0 %2147, %v2164_v27  }
 0x523   : > { %v630_v31 = vpop.xlane.xlu1 %629 }
 0x524   : > { %v631_v32 = vadd.f32 %v630_v31, %v627_v30 }
 0x526   : > { %633 = vst.msk [vmem:[#allocation4] sm:$0xff] %vm632_vm6, %v631_v32 }
 0x53a   : > { %v710_v35 = vpop.f32.mrf.mxu1 }
 0x53b   : > { %v714_v36 = vadd.f32 %v710_v35, %v640_v34 }
 0x53c   : > { %v1909_v37 = vpop.f32.mrf.mxu1 }
 0x53d   : > { %715 = vst.msk [vmem:[#allocation5] sm:$0xff] %vm457_vm3, %v714_v36 }
 0x576   : > { %v818_v41 = vpop.xlane.xlu0 %817 }
 0x577   : > { %v819_v43 = vadd.f32 %v818_v41, %v815_v40 }
 0x579   : > { %820 = vst.msk [vmem:[#allocation4 + $0x8] sm:$0xff] %vm632_vm6, %v819_v43 }
 0x57a   : > { %v1010_v45 = vpop.xlane.xlu0 %1009 }
 0x57b   : > { %v1011_v47 = vadd.f32 %v1010_v45, %v1007_v44 }
 0x57d   : > { %1012 = vst.msk [vmem:[#allocation4 + $0x10] sm:$0xff] %vm632_vm6, %v1011_v47 }
 0x57e   : > { %v1201_v49 = vpop.xlane.xlu1 %1200 }
 0x57f   : > { %v1202_v50 = vadd.f32 %v1201_v49, %v1198_v48 }
 0x581   : > { %1203 = vst.msk [vmem:[#allocation4 + $0x18] sm:$0xff] %vm632_vm6, %v1202_v50 }
 0x582   : > { %v1209_v59 = vpop.permute.xlu0 %1208 }
 0x583   : > { %v1211_v63 = vmul.f32 %v1209_v59, %v1205_v58 }
 0x5ac   : > { %v902_v54 = vpop.f32.mrf.mxu1 }
 0x5ad   : > { %v906_v55 = vadd.f32 %v902_v54, %v828_v52 }
 0x5ae   : > { %v1919_v56 = vpop.f32.mrf.mxu1 }
 0x5af   : > { %907 = vst.msk [vmem:[#allocation5 + $0x8] sm:$0xff] %vm457_vm3, %v906_v55 }
 0x5b0   : > { %v1093_v60 = vpop.f32.mrf.mxu1 }
 0x5b1   : > { %v1097_v61 = vadd.f32 %v1093_v60, %v1020_v57 }
 0x5b2   : > { %v1929_v62 = vpop.f32.mrf.mxu1 }
 0x5b3   : > { %1098 = vst.msk [vmem:[#allocation5 + $0x10] sm:$0xff] %vm457_vm3, %v1097_v61  ;;  %1294 = sbr.rel (%p1837_p12) target bundleno = 1815 (0x717), region = 64 }
 0x5b4   : > { %v1284_v0 = vpop.f32.mrf.mxu1 }
 0x5b5   : > { %v1288_v1 = vadd.f32 %v1284_v0, %v1211_v63 }
 0x5b6   : > { %v1939_v2 = vpop.f32.mrf.mxu1 }
 0x5b7   : > { %1289 = vst.msk [vmem:[#allocation5 + $0x18] sm:$0xff] %vm457_vm3, %v1288_v1 }
 0x5b8   : > { %v1309_v3 = vld [vmem:[#allocation4 + $0x8] sm:$0xff]  ;;  %v1469_v4 = vld [vmem:[#allocation4 + $0x10] sm:$0xff]  ;;  %v1296_v5 = vld [vmem:[#allocation4] sm:$0xff]  ;;  %v2453_v6 = vmov 0   ;;  %v2454_v9 = vmov 0.0   ;;  %vm2455_vm7 = vmmov 0  }
 0x5b9   : > { %2165 = vset.pattern.permute.xlu0 %v2453_v6  ;;  %2167 = vrcp.f32 %v1309_v3  ;;  %2166 = vset.pattern.permute.xlu1 %v2453_v6  ;;  %v1557_v7 = vld [vmem:[#allocation4 + $0x18] sm:$0xff]  ;;  %v1320_v10 = vld [vmem:[#allocation12 + $0x30] sm:$0xff]  ;;  %v1319_v12 = vld [vmem:[#allocation12 + $0x28] sm:$0xff] }
 0x5ba   : > { %v1321_v8 = vld [vmem:[#allocation12 + $0x38] sm:$0xff]  ;;  %2169 = vrcp.f32 %v1469_v4  ;;  %1940 = vmatprep.subr.mxu0 %v2454_v9  ;;  %1951 = vmatprep.subr.mxu1 %v2454_v9  ;;  %v1318_v13 = vld [vmem:[#allocation12 + $0x20] sm:$0xff]  ;;  %v1306_v14 = vld [vmem:[#allocation12 + $0x10] sm:$0xff] }
 0x5bb   : > { %v1307_v11 = vld [vmem:[#allocation12 + $0x18] sm:$0xff]  ;;  %2171 = vrcp.f32 %v1296_v5  ;;  %1941 = vmatpush3.msra.mxu0 %v1321_v8  ;;  %v1305_v15 = vld [vmem:[#allocation12 + $0x8] sm:$0xff]  ;;  %1948 = vmatprep.mubr.msk.f32.mxu0 %vm2455_vm7, %v2454_v9  ;;  %v1304_v19 = vld [vmem:[#allocation12] sm:$0xff] }
 0x5bc   : > { %1952 = vmatpush3.msra.mxu1 %v1307_v11  ;;  %2173 = vrcp.f32 %v1557_v7  ;;  %1942 = vmatprep.subr.mxu0 %v2454_v9  ;;  %v1308_v22 = vld [vmem:[#allocation5 + $0x8] sm:$0xff]  ;;  %v1481_v25 = vld [vmem:[#allocation12 + $0x58] sm:$0xff]  ;;  %v1295_v26 = vld [vmem:[#allocation5] sm:$0xff] }
 0x5bd   : > { %1953 = vmatprep.subr.mxu1 %v2454_v9  ;;  %1943 = vmatpush3.msra.mxu0 %v1320_v10  ;;  %v1480_v27 = vld [vmem:[#allocation12 + $0x50] sm:$0xff]  ;;  %v1479_v32 = vld [vmem:[#allocation12 + $0x48] sm:$0xff]  ;;  %v1569_v33 = vld [vmem:[#allocation12 + $0x78] sm:$0xff] }
 0x5be   : > { %1944 = vmatprep.subr.mxu0 %v2454_v9  ;;  %1954 = vmatpush3.msra.mxu1 %v1306_v14  ;;  %v1468_v28 = vld [vmem:[#allocation5 + $0x10] sm:$0xff]  ;;  %v1478_v34 = vld [vmem:[#allocation12 + $0x40] sm:$0xff]  ;;  %v1567_v36 = vld [vmem:[#allocation12 + $0x68] sm:$0xff] }
 0x5bf   : > { %1945 = vmatpush3.msra.mxu0 %v1319_v12  ;;  %1955 = vmatprep.subr.mxu1 %v2454_v9  ;;  %v1568_v35 = vld [vmem:[#allocation12 + $0x70] sm:$0xff]  ;;  %v1556_v37 = vld [vmem:[#allocation5 + $0x18] sm:$0xff]  ;;  %v1566_v39 = vld [vmem:[#allocation12 + $0x60] sm:$0xff] }
 0x5c0   : > { %1946 = vmatprep.subr.mxu0 %v2454_v9  ;;  %1956 = vmatpush3.msra.mxu1 %v1305_v15  ;;  %v1842_v50 = vld [vmem:[%s2994_s14] ss:$0 sm:$0xff] }
 0x5c1   : > { %1947 = vmatpush3.msra.mxu0 %v1318_v13  ;;  %1957 = vmatprep.subr.mxu1 %v2454_v9 }
 0x5c2   : > { %1962 = vmatprep.subr.mxu0 %v2454_v9  ;;  %1959 = vmatprep.mubr.msk.f32.mxu1 %vm2455_vm7, %v2454_v9 }
 0x5c3   : > { %1958 = vmatpush3.msra.mxu1 %v1304_v19 }
 0x5c4   : > { %1973 = vmatprep.subr.mxu1 %v2454_v9 }
 0x5c6   : > { %v2168_v17 = vpop.eup %2167 }
 0x5c7   : > { %v2170_v18 = vpop.eup %2169  ;;  %1313 = vperm.xlu0 %2165, %v2168_v17  }
 0x5c8   : > { %v2172_v20 = vpop.eup %2171  ;;  %1473 = vperm.xlu1 %2166, %v2170_v18  }
 0x5c9   : > { %v2174_v21 = vpop.eup %2173 }
 0x5cb   : > { %1300 = vperm.xlu0 %2165, %v2172_v20  }
 0x5cc   : > { %1561 = vperm.xlu1 %2166, %v2174_v21  }
 0x642   : > { %v1314_v23 = vpop.permute.xlu0 %1313 }
 0x643   : > { %v1316_v24 = vmul.f32 %v1314_v23, %v1308_v22  ;;  %v1474_v29 = vpop.permute.xlu1 %1473 }
 0x644   : > { %v1476_v16 = vmul.f32 %v1474_v29, %v1468_v28 }
 0x645   : > { %1949 = vmatmul.mubr.msk.f32.vlgmr.msra.gmra.mxu0 %vm457_vm3, %v1316_v24 }
 0x646   : > { %1963 = vmatpush3.msra.mxu0 %v1481_v25  ;;  %v1301_v30 = vpop.permute.xlu0 %1300  ;;  %1970 = vmatprep.mubr.msk.f32.mxu0 %vm2455_vm7, %v2454_v9 }
 0x647   : > { %1964 = vmatprep.subr.mxu0 %v2454_v9  ;;  %v1303_v31 = vmul.f32 %v1301_v30, %v1295_v26  ;;  %v1562_v38 = vpop.permute.xlu1 %1561 }
 0x648   : > { %1965 = vmatpush3.msra.mxu0 %v1480_v27  ;;  %v1564_v40 = vmul.f32 %v1562_v38, %v1556_v37 }
 0x649   : > { %1966 = vmatprep.subr.mxu0 %v2454_v9  ;;  %1960 = vmatmul.mubr.msk.f32.vlgmr.msra.gmra.mxu1 %vm457_vm3, %v1303_v31 }
 0x64a   : > { %1967 = vmatpush3.msra.mxu0 %v1479_v32  ;;  %1974 = vmatpush3.msra.mxu1 %v1569_v33 }
 0x64b   : > { %1968 = vmatprep.subr.mxu0 %v2454_v9  ;;  %1975 = vmatprep.subr.mxu1 %v2454_v9 }
 0x64c   : > { %1969 = vmatpush3.msra.mxu0 %v1478_v34  ;;  %1976 = vmatpush3.msra.mxu1 %v1568_v35 }
 0x64d   : > { %1971 = vmatmul.mubr.msk.f32.vlgmr.msra.gmra.mxu0 %vm457_vm3, %v1476_v16  ;;  %1977 = vmatprep.subr.mxu1 %v2454_v9 }
 0x64e   : > { %1978 = vmatpush3.msra.mxu1 %v1567_v36  ;;  %1981 = vmatprep.mubr.msk.f32.mxu1 %vm2455_vm7, %v2454_v9 }
 0x64f   : > { %1979 = vmatprep.subr.mxu1 %v2454_v9 }
 0x650   : > { %1980 = vmatpush3.msra.mxu1 %v1566_v39 }
 0x651   : > { %1982 = vmatmul.mubr.msk.f32.vlgmr.msra.gmra.mxu1 %vm457_vm3, %v1564_v40 }
 0x705   : > { %v1391_v41 = vpop.f32.mrf.mxu0 }
 0x707   : > { %v1950_v42 = vpop.f32.mrf.mxu0 }
 0x709   : > { %v1464_v43 = vpop.f32.mrf.mxu1 }
 0x70a   : > { %v1465_v45 = vadd.f32 %v1464_v43, %v1391_v41 }
 0x70b   : > { %v1961_v44 = vpop.f32.mrf.mxu1 }
 0x70d   : > { %v1551_v46 = vpop.f32.mrf.mxu0 }
 0x70e   : > { %v1555_v48 = vadd.f32 %v1551_v46, %v1465_v45 }
 0x70f   : > { %v1972_v47 = vpop.f32.mrf.mxu0 }
 0x711   : > { %v1639_v49 = vpop.f32.mrf.mxu1 }
 0x712   : > { %v1643_v51 = vadd.f32 %v1639_v49, %v1555_v48 }
 0x713   : > { %v1983_v52 = vpop.f32.mrf.mxu1 }
 0x714   : > { %v1651_v53 = vadd.f32 %v1842_v50, %v1643_v51 }
 0x716   : > { %1652 = vst.msk [vmem:[%s2734_s16] sm:$0xff] %vm457_vm3, %v1651_v53 }
 0x717 PF: > { %s2995_s15 = sld [smem:[#allocation23_spill]]  ;;  %s1669_s8 = sshll.u32 %s2734_s16, 4  ;;  %s1670_s8 = int_to_ptr.vmem [resolvable:$true] %s1669_s8 }
 0x718   : > { %s2996_s7 = sld [smem:[#allocation22_spill]]  ;;  %s1654_s21 = scalar_lea.sflag [#allocation8], %s2707_s10 }
 0x719   : > { %s2998_s18 = sld [smem:[#allocation33_spill]]  ;;  %s2283_s26 = scalar_lea.vmem %s1670_s8, 128 }
 0x71a   : > { %p2284_p0 = scmp.ne.s32.totalorder %s1670_s8, %s2283_s26  ;;  %s2456_s24 = smov [#allocation14]  }
 0x71b   : > { %s2287_s9 = sshll.u32 %s2456_s24, 4  ;;  %s2288_s9 = int_to_ptr.vmem [resolvable:$false] %s2287_s9 }
 0x71c   : > { %p2285_p13 = pnand %p2284_p0, %p2633_p9  ;;  %s2289_s14 = scalar_lea.vmem %s2288_s9, 256 }
 0x71d   : > { %s1844_s11 = sshll.u32 %s2995_s15, 1  ;;  %p2290_p11 = scmp.lt.s32.totalorder %s1670_s8, %s2288_s9 }
 0x71e   : > { %s1665_s4 = sadd.s32 %s2996_s7, %s1844_s11  ;;  %p2286_p1 = pneg %p2285_p13 }
 0x71f   : > { %s1845_s2 = sshll.u32 %s1665_s4, 7  ;;  %s2999_s5 = smov %s2998_s18 }
 0x720   : > { %s1667_s12 = scalar_lea.hbm %s2998_s18, %s1845_s2  ;;  %p2291_p7 = scmp.lt.s32.totalorder %s2289_s14, %s2283_s26 }
 0x722   : > { %p2292_p8 = por %p2291_p7, %p2290_p11 }
 0x724   : > { %p2293_p10 = pnand %p2292_p8, %p2286_p1 }
 0x726   : > { %2296 = shalt.err (!%p2293_p10)
}
 0x727   : > { %s2297_s16 = scalar_lea.hbm %s1667_s12, 128  ;;  %s2301_s7 = scalar_lea.hbm %s2999_s5, 512 }
 0x728   : > { %p2298_p3 = scmp.ne.s32.totalorder %s1667_s12, %s2297_s16  ;;  %p2302_p4 = scmp.lt.s32.totalorder %s1667_s12, %s2999_s5 }
 0x729   : > { %p2303_p5 = scmp.lt.s32.totalorder %s2301_s7, %s2297_s16 }
 0x72a   : > { %p2299_p2 = pnand %p2298_p3, %p2633_p9 }
 0x72b   : > { %p2304_p12 = por %p2303_p5, %p2302_p4 }
 0x72c   : > { %p2300_p6 = pneg %p2299_p2 }
 0x72e   : > { %p2305_p0 = pnand %p2304_p12, %p2300_p6 }
 0x730   : > { %2308 = shalt.err (!%p2305_p0)
}
 0x731   : > { %1996 = dma.vmem_to_hbm [thread:$0]  (%p2633_p9), %s1670_s8, 128, %s1667_s12, %s1654_s21  }
 0x732 PF: > { %s3000_s2 = sld [smem:[#allocation20_spill]]  ;;  %p2021_p13 = scmp.ge.s32.totalorder %s2431_s30, 2 }
 0x733   : > { %s3001_s6 = sld [smem:[#allocation29_spill]] }
 0x738   : > { %s1681_s13 = sand.u32 1, %s3000_s2  }
 0x739   : > { %p3002_p1 = scmp.ne.s32.totalorder %s3001_s6, 0  ;;  %s1682_s18 = scalar_lea.sflag [#allocation8], %s1681_s13 }
 0x73b   : > { %p2013_p11 = pnand %p2021_p13, %p3002_p1 }
 0x73d   : > { %p2014_p7 = pneg %p2013_p11 }
 0x73f   : > { %2378 = dma.done.wait (%p2014_p7), %s1682_s18, 128  }
 0x740   : > { %2380 = vsyncadd (%p2014_p7), %s1682_s18, 4294967168  ;;  %s25_s30 = sadd.s32 1, %s2431_s30   ;;  %s3004_s3 = sld [smem:[#allocation24_spill]] }
 0x741   : > { %p2897_p8 = scmp.ge.s32.totalorder %s25_s30, 10   ;;  %s3005_s8 = sld [smem:[#allocation25_spill]] }
 0x742   : > { %s3006_s12 = sld [smem:[#allocation27_spill]]  ;;  %s3008_s18 = smov %s2387_s19 }
 0x743   : > { %s3009_s19 = smov %s2391_s20  ;;  %s3010_s20 = smov %s2677_s17 }
 0x744   : > { %s3011_s21 = smov %s2399_s22  ;;  %s3012_s22 = smov %s2403_s23 }
 0x745   : > { %s3013_s23 = smov %s2651_s25  ;;  %s3014_s24 = smov %s2419_s27 }
 0x746   : > { %s3015_s25 = smov %s2423_s28  ;;  %s3016_s26 = smov %s2427_s29 }
 0x747   : > { %s3017_s27 = smov %s3004_s3  ;;  %s3018_s28 = smov %s3005_s8 }
 0x748   : > { %s3019_s29 = smov %s3006_s12  ;;  %24 = sbr.rel (!%p2897_p8) target bundleno = 18 (0x12), region = 132 }
 0x74d   :  { %1687 = vsyncpa [#allocation7], 1 }
 0x74e   :  { %1689 = vsyncpa [#allocation7 + $0x1], 1 }
 0x74f   :  { %1690 = vsyncpa [#allocation10], 1 }
 0x750   :  { %1692 = vsyncpa [#allocation10 + $0x1], 1 }
 0x751   :  { %1693 = vsyncpa [#allocation13], 1 }
 0x752   :  { %1694 = vsyncpa [#allocation8], 1 }
 0x753   :  { %1696 = vsyncpa [#allocation8 + $0x1], 1 }

</bundles_post_ra>
